<compile_context>
chip_gen: v5e
topology: v5e:2x2
jax: 0.10.0
libtpu: 0.0.40
codegen_flags: <defaults>
</compile_context>

<pallas_src>
import functools
import math

import jax
import jax.numpy as jnp
from jax.experimental import pallas as pl
from jax.experimental.pallas import tpu as pltpu

NUM_HEADS = 4
LEVELS = (1, 3, 5, 7)            # pyramid conv kernel sizes
PAD = max(LEVELS) // 2           # = 3; per-batch time zero padding
LN_EPS = 1e-5


def _erf(z):
    # Abramowitz & Stegun 7.1.26, |err| < 1.5e-7 (matches torch's exact-erf GELU in f32).
    a1, a2, a3, a4, a5 = 0.254829592, -0.284496736, 1.421413741, -1.453152027, 1.061405429
    p = 0.3275911
    az = jnp.abs(z)
    t = 1.0 / (1.0 + p * az)
    poly = t * (a1 + t * (a2 + t * (a3 + t * (a4 + t * a5))))
    res = 1.0 - poly * jnp.exp(-az * az)
    return jnp.where(z < 0, -res, res)


def _aggregator_kernel(x_ref, wqk_ref, wv_ref, wo_ref, wg_ref, wc_ref, wf_ref,
                       cols_ref, out_ref, xs_ref, *, T, TP, Bb):
    f32 = jnp.float32
    E = wv_ref.shape[0]
    H = wqk_ref.shape[0]
    L = Bb * TP
    Lx = L + 2 * PAD
    KMAX = 2 * PAD + 1
    mdt = xs_ref.dtype

    # ---- assemble the padded lane-concatenated panel in VMEM scratch ----------
    # lane layout: [PAD zeros | Bb panels of (PAD zeros | T data | PAD zeros) | PAD zeros]
    zpad = jnp.zeros((E, PAD), mdt)
    xs_ref[:, 0:PAD] = zpad
    xs_ref[:, PAD + L:Lx] = zpad
    for b in range(Bb):
        off = PAD + b * TP
        xs_ref[:, off:off + PAD] = zpad
        xs_ref[:, off + PAD:off + PAD + T] = x_ref[b]
        xs_ref[:, off + PAD + T:off + TP] = zpad

    xm = xs_ref[:, PAD:PAD + L]                  # (E, L) matmul-dtype view (panels only)
    xf = xm.astype(f32)                          # f32 copy for the statistics path

    # ---- 0/1 segment matrices from iota (no HBM inputs, no integer div/mod) ----
    li = jax.lax.broadcasted_iota(jnp.int32, (L, Bb), 0)
    bi = jax.lax.broadcasted_iota(jnp.int32, (L, Bb), 1)
    d = li - bi * TP
    seg = jnp.logical_and(d >= PAD, d < PAD + T).astype(f32)     # (L, Bb) valid-lane membership
    lj = jax.lax.broadcasted_iota(jnp.int32, (Bb, L), 1)
    bj = jax.lax.broadcasted_iota(jnp.int32, (Bb, L), 0)
    d2 = lj - bj * TP
    segb = jnp.logical_and(d2 >= 0, d2 < TP).astype(f32)         # (Bb, L) panel membership

    # ---- packed column parameters ----------------------------------------------
    bv, bo, bg, bc, bfu = (cols_ref[:, j:j + 1] for j in range(5))
    gamma, beta = cols_ref[:, 5:6], cols_ref[:, 6:7]
    rexp = cols_ref[:, 8:8 + H]                                  # (E, H) head -> channel expansion

    # ---- MultiHeadAttentionPool: all heads & batches at once --------------------
    s = jnp.dot(wqk_ref[...], xm, preferred_element_type=f32)    # (H, L) scores
    # per-(head, batch) max over each batch's valid lanes (linear in Bb)
    m = jnp.concatenate(
        [jnp.max(s[:, b * TP + PAD:b * TP + PAD + T], axis=1, keepdims=True)
         for b in range(Bb)], axis=1)                            # (H, Bb)
    mb = jnp.dot(m, segb, preferred_element_type=f32)            # (H, L) broadcast back
    # clamp <= 0 before exp: exact on valid lanes (max subtracted), bounded (<=1) on
    # padding lanes, which are then zeroed by `seg` in every downstream matmul.
    p = jnp.exp(jnp.minimum(s - mb, 0.0))                        # (H, L)
    denom = jnp.dot(p, seg, preferred_element_type=f32)          # (H, Bb)
    inv = pl.reciprocal(denom, approx=True)                      # EUP seed
    inv = inv * (2.0 - denom * inv)                              # one Newton step -> f32 exact
    a = p * jnp.dot(inv, segb, preferred_element_type=f32)       # (H, L) softmax weights
    v = jnp.dot(wv_ref[...], xm, preferred_element_type=f32) + bv         # (E, L)
    af = jnp.dot(rexp, a, preferred_element_type=f32)            # (E, L) per-channel weights
    ctx = jnp.dot(af * v, seg, preferred_element_type=f32)       # (E, Bb)
    h1 = jnp.dot(wo_ref[...], ctx.astype(wo_ref.dtype),
                 preferred_element_type=f32) + bo                # (E, Bb)

    # ---- GatedStatisticalPool ----------------------------------------------------
    mean = jnp.dot(xf, seg, preferred_element_type=f32) * jnp.float32(1.0 / T)
    cen = xf - jnp.dot(mean, segb, preferred_element_type=f32)
    # NOTE: unbiased std (ddof=1) like torch.std; non-finite for T == 1 (matches torch).
    var = jnp.dot(cen * cen, seg, preferred_element_type=f32) * jnp.float32(1.0 / (T - 1))
    std = jnp.sqrt(var)
    gate = jax.nn.sigmoid(
        jnp.dot(wg_ref[:, 0:E], mean.astype(wg_ref.dtype), preferred_element_type=f32)
        + jnp.dot(wg_ref[:, E:2 * E], std.astype(wg_ref.dtype), preferred_element_type=f32)
        + bg)
    h2 = gate * mean + (1.0 - gate) * std                        # (E, Bb)

    # ---- STPyramidPool -----------------------------------------------------------
    if E >= 64:
        # 7 shifted (E,E)x(E,L) matmuls accumulated in place (no (7E,L) stack)
        conv = jnp.dot(wc_ref[:, 0:E], xs_ref[:, 0:L], preferred_element_type=f32)
        for j in range(1, KMAX):
            tap = xm if j == PAD else xs_ref[:, j:j + L]
            conv = conv + jnp.dot(wc_ref[:, j * E:(j + 1) * E], tap,
                                  preferred_element_type=f32)
    else:
        # tiny E: one deep (7E) contraction fills the MXU better
        xstack = jnp.concatenate([xs_ref[:, j:j + L] for j in range(KMAX)], axis=0)
        conv = jnp.dot(wc_ref[...], xstack, preferred_element_type=f32)    # (E, L)
    h3 = jnp.concatenate(
        [jnp.max(conv[:, b * TP + PAD:b * TP + PAD + T], axis=1, keepdims=True)
         for b in range(Bb)], axis=1) + bc                       # (E, Bb)

    # ---- fusion: Linear(3E->E) + LayerNorm + exact-erf GELU (dropout p=0) --------
    wdt = wf_ref.dtype
    lin = (jnp.dot(wf_ref[:, 0:E], h1.astype(wdt), preferred_element_type=f32)
           + jnp.dot(wf_ref[:, E:2 * E], h2.astype(wdt), preferred_element_type=f32)
           + jnp.dot(wf_ref[:, 2 * E:3 * E], h3.astype(wdt), preferred_element_type=f32)
           + bfu)                                                # (E, Bb)
    mu = jnp.mean(lin, axis=0, keepdims=True)
    varln = jnp.mean((lin - mu) ** 2, axis=0, keepdims=True)
    y = (lin - mu) * jax.lax.rsqrt(varln + LN_EPS) * gamma + beta
    out = 0.5 * y * (1.0 + _erf(y * (1.0 / math.sqrt(2.0))))
    out_ref[0] = out.astype(out_ref.dtype)


# ----------------------------- parameter setup (glue) ------------------------
def init_params(key, E):
    Co = E // len(LEVELS)
    ks = jax.random.split(key, 24)

    def rn(i, shape, scale=0.1):
        return scale * jax.random.normal(ks[i], shape, dtype=jnp.float32)

    return {
        "query": rn(0, (1, E), 0.5),
        "in_proj_w": rn(1, (3 * E, E)),
        "in_proj_b": rn(2, (3 * E,)),
        "out_proj_w": rn(3, (E, E)),
        "out_proj_b": rn(4, (E,)),
        "gate_w": rn(5, (E, 2 * E)),
        "gate_b": rn(6, (E,)),
        "conv_w": [rn(7 + i, (Co, E, k)) for i, k in enumerate(LEVELS)],
        "conv_b": [rn(11 + i, (Co,)) for i in range(len(LEVELS))],
        "fusion_w": rn(15, (E, 3 * E)),
        "fusion_b": rn(16, (E,)),
        "ln_gamma": 1.0 + rn(17, (E,)),
        "ln_beta": rn(18, (E,)),
    }


def _pack_params(p, E, matmul_dtype):
    H = NUM_HEADS
    DH = E // H
    Co = E // len(LEVELS)
    f32 = jnp.float32

    Wq, Wk, Wv = p["in_proj_w"][:E], p["in_proj_w"][E:2 * E], p["in_proj_w"][2 * E:]
    bq = p["in_proj_b"][:E]
    bv = p["in_proj_b"][2 * E:]

    # Learned query: project, scale by 1/sqrt(DH), fold per-head into the key projection.
    # (q_h . b_k,h is a per-head constant over time, so it cancels in the softmax.)
    q = ((p["query"][0] @ Wq.T + bq) * (DH ** -0.5)).reshape(H, DH)
    wqk = jnp.einsum("hd,hde->he", q, Wk.reshape(H, DH, E))            # (H, E)

    # 4 pyramid convs -> one centered 7-tap weight, flattened to (E, 7E)
    KMAX = 2 * PAD + 1
    Wc = jnp.zeros((KMAX, E, E), f32)
    bc = jnp.zeros((E,), f32)
    for l, ksz in enumerate(LEVELS):
        off = PAD - ksz // 2
        for j in range(ksz):
            Wc = Wc.at[off + j, l * Co:(l + 1) * Co, :].set(p["conv_w"][l][:, :, j])
        bc = bc.at[l * Co:(l + 1) * Co].set(p["conv_b"][l])
    wc = Wc.transpose(1, 0, 2).reshape(E, KMAX * E)

    # head->channel expansion (0/1) packed together with all (E,1) column params
    rexp = (jnp.arange(E)[:, None] // DH == jnp.arange(H)[None, :]).astype(f32)
    cols = jnp.concatenate(
        [jnp.stack([bv, p["out_proj_b"], p["gate_b"], bc, p["fusion_b"],
                    p["ln_gamma"], p["ln_beta"], jnp.zeros((E,), f32)], axis=1),
         rexp], axis=1)                                                # (E, 8 + H)

    cast = lambda w: w.astype(matmul_dtype)
    return dict(wqk=cast(wqk), wv=cast(Wv), wo=cast(p["out_proj_w"]),
                wg=cast(p["gate_w"]), wc=cast(wc), wf=cast(p["fusion_w"]),
                cols=cols.astype(f32))


@functools.partial(jax.jit, static_argnames=("block_b", "matmul_dtype"))
def aggregator_forward(x, params, *, block_b=None, matmul_dtype=jnp.float32):
    B, E, T = x.shape
    TP = T + 2 * PAD
    dsize = jnp.dtype(matmul_dtype).itemsize

    # generation-aware VMEM budget (v5e/v6e: 128 MiB physical -> ~96 MiB limit;
    # v7x: 64 MiB physical, 2 TensorCores -> ~48 MiB limit)
    try:
        vmem_cap = int(pltpu.get_tpu_info().vmem_capacity_bytes)
    except Exception:
        vmem_cap = 64 * 1024 * 1024
    vmem_limit = max(32 * 1024 * 1024, min(vmem_cap * 3 // 4, 100 * 1024 * 1024))
    two_tc = vmem_cap <= 64 * 1024 * 1024        # v7x is the 64-MiB / 2-TC generation

    if block_b is None:
        budget = int(vmem_limit * 0.85)
        # per extra batch: double-buffered (Bb,E,T) input block, (E,TP) slice of the
        # panel scratch, ~6 live (E,L) f32 temporaries, and the 128-lane-padded
        # (L,Bb) seg matrix; fixed: the (double-buffered) packed weights.
        per_b = 2 * E * T * dsize + E * TP * dsize + 6 * E * TP * 4 + 512 * TP
        fixed = 2 * 16 * E * E * dsize + 4 * E * 16 * 4 + 2 * E * 2 * PAD * dsize
        cap = max(1, (budget - fixed) // per_b)
        block_b = min(B, cap)
        if two_tc and B >= 2:
            # keep the grid >= 2 so both v7x TensorCores get work; single-TC
            # v5e/v6e keep the full lane-dense block instead.
            block_b = max(1, min(block_b, (B + 1) // 2))
    Bb = int(block_b)
    G = pl.cdiv(B, Bb)
    Bp = G * Bb
    Lx = Bb * TP + 2 * PAD

    pk = _pack_params(params, E, matmul_dtype)

    xin = x.astype(matmul_dtype)
    if Bp != B:
        xin = jnp.pad(xin, ((0, Bp - B), (0, 0), (0, 0)))

    kernel = functools.partial(_aggregator_kernel, T=T, TP=TP, Bb=Bb)
    weights = [pk["wqk"], pk["wv"], pk["wo"], pk["wg"], pk["wc"], pk["wf"], pk["cols"]]

    def rep(a):
        return pl.BlockSpec(a.shape, lambda g: (0,) * a.ndim)

    out = pl.pallas_call(
        kernel,
        out_shape=jax.ShapeDtypeStruct((G, E, Bb), jnp.float32),
        grid_spec=pltpu.PrefetchScalarGridSpec(
            num_scalar_prefetch=0,
            grid=(G,),
            in_specs=[pl.BlockSpec((Bb, E, T), lambda g: (g, 0, 0))] +
                     [rep(a) for a in weights],
            out_specs=pl.BlockSpec((1, E, Bb), lambda g: (g, 0, 0)),
            scratch_shapes=[pltpu.VMEM((E, Lx), matmul_dtype)],
        ),
        compiler_params=pltpu.CompilerParams(
            dimension_semantics=("parallel",),
            vmem_limit_bytes=int(vmem_limit)),
    )(xin, *weights)

    # (G, E, Bb) -> (B, E); the fused embedding is a few KiB, so this is cheap glue.
    return out.transpose(0, 2, 1).reshape(Bp, E)[:B]


# ----------------------------- pure-JAX reference ----------------------------
def reference_forward(x, p):
    B, E, T = x.shape
    DH = E // NUM_HEADS
    Wq, Wk, Wv = p["in_proj_w"][:E], p["in_proj_w"][E:2 * E], p["in_proj_w"][2 * E:]
    bq = p["in_proj_b"][:E]
    bk = p["in_proj_b"][E:2 * E]
    bv = p["in_proj_b"][2 * E:]

    # MultiHeadAttentionPool on x.permute(2, 0, 1) -> (T, B, E)
    xt = jnp.transpose(x, (2, 0, 1))
    q = (p["query"] @ Wq.T + bq) * (DH ** -0.5)              # (1, E)
    k = xt @ Wk.T + bk                                       # (T, B, E)
    v = xt @ Wv.T + bv
    qh = q.reshape(NUM_HEADS, DH)
    kh = k.reshape(T, B, NUM_HEADS, DH)
    vh = v.reshape(T, B, NUM_HEADS, DH)
    scores = jnp.einsum("hd,tbhd->bht", qh, kh)
    attn = jax.nn.softmax(scores, axis=-1)
    ctx = jnp.einsum("bht,tbhd->bhd", attn, vh).reshape(B, E)
    h1 = ctx @ p["out_proj_w"].T + p["out_proj_b"]

    # GatedStatisticalPool
    mean = x.mean(axis=-1)
    std = jnp.std(x, axis=-1, ddof=1)
    stats = jnp.concatenate([mean, std], axis=-1)
    gate = jax.nn.sigmoid(stats @ p["gate_w"].T + p["gate_b"])
    h2 = gate * mean + (1 - gate) * std

    # STPyramidPool
    pooled = []
    for l, ksz in enumerate(LEVELS):
        c = jax.lax.conv_general_dilated(
            x, p["conv_w"][l], window_strides=(1,),
            padding=[(ksz // 2, ksz // 2)],
            dimension_numbers=("NCH", "OIH", "NCH"))
        c = c + p["conv_b"][l][None, :, None]
        pooled.append(jnp.max(c, axis=-1))
    h3 = jnp.concatenate(pooled, axis=-1)

    fused = jnp.concatenate([h1, h2, h3], axis=-1)
    lin = fused @ p["fusion_w"].T + p["fusion_b"]
    mu = lin.mean(axis=-1, keepdims=True)
    var = ((lin - mu) ** 2).mean(axis=-1, keepdims=True)
    y = (lin - mu) / jnp.sqrt(var + LN_EPS) * p["ln_gamma"] + p["ln_beta"]
    return 0.5 * y * (1.0 + jax.scipy.special.erf(y / math.sqrt(2.0)))


if __name__ == "__main__":
    key = jax.random.PRNGKey(0)
    k1, k2, k3, k4 = jax.random.split(key, 4)

    # case 1: embed_dim=32 (stacked-conv path, E < 64), B=2, T=16
    B, E, T = 2, 32, 16
    x = jax.random.normal(k1, (B, E, T), dtype=jnp.float32)
    params = init_params(k2, E)
    ref = jax.block_until_ready(reference_forward(x, params))

    out = jax.block_until_ready(aggregator_forward(x, params))
    assert out.shape == (B, E), out.shape
    err = float(jnp.max(jnp.abs(out - ref)))
    if err > 1e-3:
        raise AssertionError(f"f32 kernel/reference mismatch, max abs err = {err}")

    # explicit Bb=2 (whole batch in a single grid step) must agree as well
    out_b2 = jax.block_until_ready(aggregator_forward(x, params, block_b=2))
    err_b2 = float(jnp.max(jnp.abs(out_b2 - ref)))
    if err_b2 > 1e-3:
        raise AssertionError(f"Bb=2 kernel/reference mismatch, max abs err = {err_b2}")

    # bf16-MXU fast path (bf16 x DMA + bf16 weights; f32 accumulation, softmax,
    # statistics, LayerNorm and GELU stay f32)
    out_bf = jax.block_until_ready(
        aggregator_forward(x, params, matmul_dtype=jnp.bfloat16))
    err_bf = float(jnp.max(jnp.abs(out_bf - ref)))
    if err_bf > 5e-2:
        raise AssertionError(f"bf16 kernel/reference mismatch, max abs err = {err_bf}")

    # case 2: embed_dim=128 (accumulated-conv path, E >= 64), odd T, and a batch
    # count that exercises batch padding when the grid is split across 2 TCs.
    B2, E2, T2 = 3, 128, 10
    x2 = jax.random.normal(k3, (B2, E2, T2), dtype=jnp.float32)
    params2 = init_params(k4, E2)
    ref2 = jax.block_until_ready(reference_forward(x2, params2))
    out2 = jax.block_until_ready(aggregator_forward(x2, params2))
    err2 = float(jnp.max(jnp.abs(out2 - ref2)))
    if err2 > 1e-3:
        raise AssertionError(f"E=128 kernel/reference mismatch, max abs err = {err2}")

    print("KERNEL_OK")
</pallas_src>

<mosaic_0001>
module attributes {stable_mosaic.version = 11 : i64} {
  func.func @_aggregator_kernel(%arg0: i32, %arg1: memref<1x32x16xf32, #tpu.memory_space<vmem>>, %arg2: memref<4x32xf32, #tpu.memory_space<vmem>>, %arg3: memref<32x32xf32, #tpu.memory_space<vmem>>, %arg4: memref<32x32xf32, #tpu.memory_space<vmem>>, %arg5: memref<32x64xf32, #tpu.memory_space<vmem>>, %arg6: memref<32x224xf32, #tpu.memory_space<vmem>>, %arg7: memref<32x96xf32, #tpu.memory_space<vmem>>, %arg8: memref<32x12xf32, #tpu.memory_space<vmem>>, %arg9: memref<1x32x1xf32, #tpu.memory_space<vmem>>, %arg10: memref<32x28xf32, #tpu.memory_space<vmem>>) attributes {dimension_semantics = [#tpu.dimension_semantics<parallel>], iteration_bounds = array<i64: 2>, scalar_prefetch = 0 : i64, scratch_operands = 1 : i64, tpu.core_type = #tpu.core_type<tc>, window_params = [{transform_indices = @transform_0, window_bounds = array<i64: 1, 32, 16>}, {pipeline_mode = #tpu.pipeline_mode<synchronous>, transform_indices = @transform_1, window_bounds = array<i64: 4, 32>}, {pipeline_mode = #tpu.pipeline_mode<synchronous>, transform_indices = @transform_2, window_bounds = array<i64: 32, 32>}, {pipeline_mode = #tpu.pipeline_mode<synchronous>, transform_indices = @transform_3, window_bounds = array<i64: 32, 32>}, {pipeline_mode = #tpu.pipeline_mode<synchronous>, transform_indices = @transform_4, window_bounds = array<i64: 32, 64>}, {pipeline_mode = #tpu.pipeline_mode<synchronous>, transform_indices = @transform_5, window_bounds = array<i64: 32, 224>}, {pipeline_mode = #tpu.pipeline_mode<synchronous>, transform_indices = @transform_6, window_bounds = array<i64: 32, 96>}, {pipeline_mode = #tpu.pipeline_mode<synchronous>, transform_indices = @transform_7, window_bounds = array<i64: 32, 12>}, {transform_indices = @transform_8, window_bounds = array<i64: 1, 32, 1>}]} {
    %cst = arith.constant 0.000000e+00 : f32
    %0 = vector.broadcast %cst : f32 to vector<32x3xf32>
    %c0 = arith.constant 0 : index
    %c0_0 = arith.constant 0 : index
    %1 = vector.load %arg10[%c0, %c0_0] : memref<32x28xf32, #tpu.memory_space<vmem>>, vector<32x3xf32>
    tpu.vector_store %arg10[%c0, %c0_0], %0 {strides = array<i32>} : memref<32x28xf32, #tpu.memory_space<vmem>>, vector<32x3xf32>,
    %c0_1 = arith.constant 0 : index
    %c25 = arith.constant 25 : index
    %2 = vector.load %arg10[%c0_1, %c25] : memref<32x28xf32, #tpu.memory_space<vmem>>, vector<32x3xf32>
    tpu.vector_store %arg10[%c0_1, %c25], %0 {strides = array<i32>} : memref<32x28xf32, #tpu.memory_space<vmem>>, vector<32x3xf32>,
    %c0_2 = arith.constant 0 : index
    %c3 = arith.constant 3 : index
    %3 = vector.load %arg10[%c0_2, %c3] : memref<32x28xf32, #tpu.memory_space<vmem>>, vector<32x3xf32>
    tpu.vector_store %arg10[%c0_2, %c3], %0 {strides = array<i32>} : memref<32x28xf32, #tpu.memory_space<vmem>>, vector<32x3xf32>,
    %c0_3 = arith.constant 0 : index
    %c0_4 = arith.constant 0 : index
    %c0_5 = arith.constant 0 : index
    %4 = vector.load %arg1[%c0_3, %c0_4, %c0_5] : memref<1x32x16xf32, #tpu.memory_space<vmem>>, vector<1x32x16xf32>
    %5 = vector.shape_cast %4 : vector<1x32x16xf32> to vector<32x16xf32>
    %c0_6 = arith.constant 0 : index
    %c6 = arith.constant 6 : index
    %6 = vector.load %arg10[%c0_6, %c6] : memref<32x28xf32, #tpu.memory_space<vmem>>, vector<32x16xf32>
    tpu.vector_store %arg10[%c0_6, %c6], %5 {strides = array<i32>} : memref<32x28xf32, #tpu.memory_space<vmem>>, vector<32x16xf32>,
    %c0_7 = arith.constant 0 : index
    %c22 = arith.constant 22 : index
    %7 = vector.load %arg10[%c0_7, %c22] : memref<32x28xf32, #tpu.memory_space<vmem>>, vector<32x3xf32>
    tpu.vector_store %arg10[%c0_7, %c22], %0 {strides = array<i32>} : memref<32x28xf32, #tpu.memory_space<vmem>>, vector<32x3xf32>,
    %c0_8 = arith.constant 0 : index
    %c3_9 = arith.constant 3 : index
    %8 = vector.load %arg10[%c0_8, %c3_9] : memref<32x28xf32, #tpu.memory_space<vmem>>, vector<32x22xf32>
    %9 = tpu.iota {dimensions = array<i32: 0>} : vector<22x1xi32>
    %10 = tpu.iota {dimensions = array<i32: 1>} : vector<22x1xi32>
    %c22_i32 = arith.constant 22 : i32
    %11 = vector.broadcast %c22_i32 : i32 to vector<22x1xi32>
    %12 = arith.muli %10, %11 : vector<22x1xi32>
    %13 = arith.subi %9, %12 : vector<22x1xi32>
    %c3_i32 = arith.constant 3 : i32
    %14 = vector.broadcast %c3_i32 : i32 to vector<22x1xi32>
    %15 = arith.cmpi sge, %13, %14 : vector<22x1xi32>
    %c19_i32 = arith.constant 19 : i32
    %16 = vector.broadcast %c19_i32 : i32 to vector<22x1xi32>
    %17 = arith.cmpi slt, %13, %16 : vector<22x1xi32>
    %18 = arith.andi %15, %17 : vector<22x1xi1>
    %19 = arith.extui %18 : vector<22x1xi1> to vector<22x1xi32>
    %20 = arith.sitofp %19 : vector<22x1xi32> to vector<22x1xf32>
    %21 = tpu.iota {dimensions = array<i32: 1>} : vector<1x22xi32>
    %22 = tpu.iota {dimensions = array<i32: 0>} : vector<1x22xi32>
    %c22_i32_10 = arith.constant 22 : i32
    %23 = vector.broadcast %c22_i32_10 : i32 to vector<1x22xi32>
    %24 = arith.muli %22, %23 : vector<1x22xi32>
    %25 = arith.subi %21, %24 : vector<1x22xi32>
    %c0_i32 = arith.constant 0 : i32
    %26 = vector.broadcast %c0_i32 : i32 to vector<1x22xi32>
    %27 = arith.cmpi sge, %25, %26 : vector<1x22xi32>
    %c22_i32_11 = arith.constant 22 : i32
    %28 = vector.broadcast %c22_i32_11 : i32 to vector<1x22xi32>
    %29 = arith.cmpi slt, %25, %28 : vector<1x22xi32>
    %30 = arith.andi %27, %29 : vector<1x22xi1>
    %31 = arith.extui %30 : vector<1x22xi1> to vector<1x22xi32>
    %32 = arith.sitofp %31 : vector<1x22xi32> to vector<1x22xf32>
    %c0_12 = arith.constant 0 : index
    %c0_13 = arith.constant 0 : index
    %33 = vector.load %arg8[%c0_12, %c0_13] : memref<32x12xf32, #tpu.memory_space<vmem>>, vector<32x1xf32>
    %c0_14 = arith.constant 0 : index
    %c1 = arith.constant 1 : index
    %34 = vector.load %arg8[%c0_14, %c1] : memref<32x12xf32, #tpu.memory_space<vmem>>, vector<32x1xf32>
    %c0_15 = arith.constant 0 : index
    %c2 = arith.constant 2 : index
    %35 = vector.load %arg8[%c0_15, %c2] : memref<32x12xf32, #tpu.memory_space<vmem>>, vector<32x1xf32>
    %c0_16 = arith.constant 0 : index
    %c3_17 = arith.constant 3 : index
    %36 = vector.load %arg8[%c0_16, %c3_17] : memref<32x12xf32, #tpu.memory_space<vmem>>, vector<32x1xf32>
    %c0_18 = arith.constant 0 : index
    %c4 = arith.constant 4 : index
    %37 = vector.load %arg8[%c0_18, %c4] : memref<32x12xf32, #tpu.memory_space<vmem>>, vector<32x1xf32>
    %c0_19 = arith.constant 0 : index
    %c5 = arith.constant 5 : index
    %38 = vector.load %arg8[%c0_19, %c5] : memref<32x12xf32, #tpu.memory_space<vmem>>, vector<32x1xf32>
    %c0_20 = arith.constant 0 : index
    %c6_21 = arith.constant 6 : index
    %39 = vector.load %arg8[%c0_20, %c6_21] : memref<32x12xf32, #tpu.memory_space<vmem>>, vector<32x1xf32>
    %c0_22 = arith.constant 0 : index
    %c8 = arith.constant 8 : index
    %40 = vector.load %arg8[%c0_22, %c8] : memref<32x12xf32, #tpu.memory_space<vmem>>, vector<32x4xf32>
    %c0_23 = arith.constant 0 : index
    %c0_24 = arith.constant 0 : index
    %41 = vector.load %arg2[%c0_23, %c0_24] : memref<4x32xf32, #tpu.memory_space<vmem>>, vector<4x32xf32>
    %cst_25 = arith.constant dense<0.000000e+00> : vector<4x22xf32>
    %42 = tpu.matmul %41, %8, %cst_25 {dimension_numbers = #tpu.dot_dimension_numbers<[1], [0], [0], [1], [0, 0, 1, 1], [], []>} : vector<4x32xf32>, vector<32x22xf32>, vector<4x22xf32> -> vector<4x22xf32>
    %43 = vector.extract_strided_slice %42 {offsets = [0, 3], sizes = [4, 16], strides = [1, 1]} : vector<4x22xf32> to vector<4x16xf32>
    %cst_26 = arith.constant dense<0xFF800000> : vector<4xf32>
    %44 = vector.multi_reduction <maximumf>, %43, %cst_26 [1] : vector<4x16xf32> to vector<4xf32>
    %45 = vector.shape_cast %44 : vector<4xf32> to vector<4x1xf32>
    %cst_27 = arith.constant dense<0.000000e+00> : vector<4x22xf32>
    %46 = tpu.matmul %45, %32, %cst_27 {dimension_numbers = #tpu.dot_dimension_numbers<[1], [0], [0], [1], [0, 0, 1, 1], [], []>} : vector<4x1xf32>, vector<1x22xf32>, vector<4x22xf32> -> vector<4x22xf32>
    %47 = arith.subf %42, %46 : vector<4x22xf32>
    %cst_28 = arith.constant 0.000000e+00 : f32
    %48 = vector.broadcast %cst_28 : f32 to vector<4x22xf32>
    %49 = arith.minimumf %47, %48 : vector<4x22xf32>
    %50 = math.exp %49 : vector<4x22xf32>
    %cst_29 = arith.constant dense<0.000000e+00> : vector<4x1xf32>
    %51 = tpu.matmul %50, %20, %cst_29 {dimension_numbers = #tpu.dot_dimension_numbers<[1], [0], [0], [1], [0, 0, 1, 1], [], []>} : vector<4x22xf32>, vector<22x1xf32>, vector<4x1xf32> -> vector<4x1xf32>
    %52 = tpu.reciprocal %51 {approx = true} : vector<4x1xf32> -> vector<4x1xf32>
    %53 = arith.mulf %51, %52 : vector<4x1xf32>
    %cst_30 = arith.constant 2.000000e+00 : f32
    %54 = vector.broadcast %cst_30 : f32 to vector<4x1xf32>
    %55 = arith.subf %54, %53 : vector<4x1xf32>
    %56 = arith.mulf %52, %55 : vector<4x1xf32>
    %cst_31 = arith.constant dense<0.000000e+00> : vector<4x22xf32>
    %57 = tpu.matmul %56, %32, %cst_31 {dimension_numbers = #tpu.dot_dimension_numbers<[1], [0], [0], [1], [0, 0, 1, 1], [], []>} : vector<4x1xf32>, vector<1x22xf32>, vector<4x22xf32> -> vector<4x22xf32>
    %58 = arith.mulf %50, %57 : vector<4x22xf32>
    %c0_32 = arith.constant 0 : index
    %c0_33 = arith.constant 0 : index
    %59 = vector.load %arg3[%c0_32, %c0_33] : memref<32x32xf32, #tpu.memory_space<vmem>>, vector<32x32xf32>
    %cst_34 = arith.constant dense<0.000000e+00> : vector<32x22xf32>
    %60 = tpu.matmul %59, %8, %cst_34 {dimension_numbers = #tpu.dot_dimension_numbers<[1], [0], [0], [1], [0, 0, 1, 1], [], []>} : vector<32x32xf32>, vector<32x22xf32>, vector<32x22xf32> -> vector<32x22xf32>
    %61 = vector.broadcast %33 : vector<32x1xf32> to vector<32x22xf32>
    %62 = arith.addf %60, %61 : vector<32x22xf32>
    %cst_35 = arith.constant dense<0.000000e+00> : vector<32x22xf32>
    %63 = tpu.matmul %40, %58, %cst_35 {dimension_numbers = #tpu.dot_dimension_numbers<[1], [0], [0], [1], [0, 0, 1, 1], [], []>} : vector<32x4xf32>, vector<4x22xf32>, vector<32x22xf32> -> vector<32x22xf32>
    %64 = arith.mulf %63, %62 : vector<32x22xf32>
    %cst_36 = arith.constant dense<0.000000e+00> : vector<32x1xf32>
    %65 = tpu.matmul %64, %20, %cst_36 {dimension_numbers = #tpu.dot_dimension_numbers<[1], [0], [0], [1], [0, 0, 1, 1], [], []>} : vector<32x22xf32>, vector<22x1xf32>, vector<32x1xf32> -> vector<32x1xf32>
    %c0_37 = arith.constant 0 : index
    %c0_38 = arith.constant 0 : index
    %66 = vector.load %arg4[%c0_37, %c0_38] : memref<32x32xf32, #tpu.memory_space<vmem>>, vector<32x32xf32>
    %cst_39 = arith.constant dense<0.000000e+00> : vector<32x1xf32>
    %67 = tpu.matmul %66, %65, %cst_39 {dimension_numbers = #tpu.dot_dimension_numbers<[1], [0], [0], [1], [0, 0, 1, 1], [], []>} : vector<32x32xf32>, vector<32x1xf32>, vector<32x1xf32> -> vector<32x1xf32>
    %68 = arith.addf %67, %34 : vector<32x1xf32>
    %cst_40 = arith.constant dense<0.000000e+00> : vector<32x1xf32>
    %69 = tpu.matmul %8, %20, %cst_40 {dimension_numbers = #tpu.dot_dimension_numbers<[1], [0], [0], [1], [0, 0, 1, 1], [], []>} : vector<32x22xf32>, vector<22x1xf32>, vector<32x1xf32> -> vector<32x1xf32>
    %cst_41 = arith.constant 6.250000e-02 : f32
    %70 = vector.broadcast %cst_41 : f32 to vector<32x1xf32>
    %71 = arith.mulf %69, %70 : vector<32x1xf32>
    %cst_42 = arith.constant dense<0.000000e+00> : vector<32x22xf32>
    %72 = tpu.matmul %71, %32, %cst_42 {dimension_numbers = #tpu.dot_dimension_numbers<[1], [0], [0], [1], [0, 0, 1, 1], [], []>} : vector<32x1xf32>, vector<1x22xf32>, vector<32x22xf32> -> vector<32x22xf32>
    %73 = arith.subf %8, %72 : vector<32x22xf32>
    %74 = arith.mulf %73, %73 : vector<32x22xf32>
    %cst_43 = arith.constant dense<0.000000e+00> : vector<32x1xf32>
    %75 = tpu.matmul %74, %20, %cst_43 {dimension_numbers = #tpu.dot_dimension_numbers<[1], [0], [0], [1], [0, 0, 1, 1], [], []>} : vector<32x22xf32>, vector<22x1xf32>, vector<32x1xf32> -> vector<32x1xf32>
    %cst_44 = arith.constant 0.0666666701 : f32
    %76 = vector.broadcast %cst_44 : f32 to vector<32x1xf32>
    %77 = arith.mulf %75, %76 : vector<32x1xf32>
    %78 = math.sqrt %77 : vector<32x1xf32>
    %c0_45 = arith.constant 0 : index
    %c0_46 = arith.constant 0 : index
    %79 = vector.load %arg5[%c0_45, %c0_46] : memref<32x64xf32, #tpu.memory_space<vmem>>, vector<32x32xf32>
    %cst_47 = arith.constant dense<0.000000e+00> : vector<32x1xf32>
    %80 = tpu.matmul %79, %71, %cst_47 {dimension_numbers = #tpu.dot_dimension_numbers<[1], [0], [0], [1], [0, 0, 1, 1], [], []>} : vector<32x32xf32>, vector<32x1xf32>, vector<32x1xf32> -> vector<32x1xf32>
    %c0_48 = arith.constant 0 : index
    %c32 = arith.constant 32 : index
    %81 = vector.load %arg5[%c0_48, %c32] : memref<32x64xf32, #tpu.memory_space<vmem>>, vector<32x32xf32>
    %cst_49 = arith.constant dense<0.000000e+00> : vector<32x1xf32>
    %82 = tpu.matmul %81, %78, %cst_49 {dimension_numbers = #tpu.dot_dimension_numbers<[1], [0], [0], [1], [0, 0, 1, 1], [], []>} : vector<32x32xf32>, vector<32x1xf32>, vector<32x1xf32> -> vector<32x1xf32>
    %83 = arith.addf %80, %82 : vector<32x1xf32>
    %84 = arith.addf %83, %35 : vector<32x1xf32>
    %85 = arith.negf %84 : vector<32x1xf32>
    %86 = math.exp %85 : vector<32x1xf32>
    %cst_50 = arith.constant 1.000000e+00 : f32
    %87 = vector.broadcast %cst_50 : f32 to vector<32x1xf32>
    %88 = arith.addf %87, %86 : vector<32x1xf32>
    %89 = arith.divf %87, %88 : vector<32x1xf32>
    %90 = arith.mulf %89, %71 : vector<32x1xf32>
    %cst_51 = arith.constant 1.000000e+00 : f32
    %91 = vector.broadcast %cst_51 : f32 to vector<32x1xf32>
    %92 = arith.subf %91, %89 : vector<32x1xf32>
    %93 = arith.mulf %92, %78 : vector<32x1xf32>
    %94 = arith.addf %90, %93 : vector<32x1xf32>
    %c0_52 = arith.constant 0 : index
    %c0_53 = arith.constant 0 : index
    %95 = vector.load %arg10[%c0_52, %c0_53] : memref<32x28xf32, #tpu.memory_space<vmem>>, vector<32x22xf32>
    %c0_54 = arith.constant 0 : index
    %c1_55 = arith.constant 1 : index
    %96 = vector.load %arg10[%c0_54, %c1_55] : memref<32x28xf32, #tpu.memory_space<vmem>>, vector<32x22xf32>
    %c0_56 = arith.constant 0 : index
    %c2_57 = arith.constant 2 : index
    %97 = vector.load %arg10[%c0_56, %c2_57] : memref<32x28xf32, #tpu.memory_space<vmem>>, vector<32x22xf32>
    %c0_58 = arith.constant 0 : index
    %c3_59 = arith.constant 3 : index
    %98 = vector.load %arg10[%c0_58, %c3_59] : memref<32x28xf32, #tpu.memory_space<vmem>>, vector<32x22xf32>
    %c0_60 = arith.constant 0 : index
    %c4_61 = arith.constant 4 : index
    %99 = vector.load %arg10[%c0_60, %c4_61] : memref<32x28xf32, #tpu.memory_space<vmem>>, vector<32x22xf32>
    %c0_62 = arith.constant 0 : index
    %c5_63 = arith.constant 5 : index
    %100 = vector.load %arg10[%c0_62, %c5_63] : memref<32x28xf32, #tpu.memory_space<vmem>>, vector<32x22xf32>
    %c0_64 = arith.constant 0 : index
    %c6_65 = arith.constant 6 : index
    %101 = vector.load %arg10[%c0_64, %c6_65] : memref<32x28xf32, #tpu.memory_space<vmem>>, vector<32x22xf32>
    %102 = tpu.concatenate %95, %96, %97, %98, %99, %100, %101 in 0 : vector<32x22xf32>, vector<32x22xf32>, vector<32x22xf32>, vector<32x22xf32>, vector<32x22xf32>, vector<32x22xf32>, vector<32x22xf32> -> vector<224x22xf32>
    %c0_66 = arith.constant 0 : index
    %c0_67 = arith.constant 0 : index
    %103 = vector.load %arg6[%c0_66, %c0_67] : memref<32x224xf32, #tpu.memory_space<vmem>>, vector<32x224xf32>
    %cst_68 = arith.constant dense<0.000000e+00> : vector<32x22xf32>
    %104 = tpu.matmul %103, %102, %cst_68 {dimension_numbers = #tpu.dot_dimension_numbers<[1], [0], [0], [1], [0, 0, 1, 1], [], []>} : vector<32x224xf32>, vector<224x22xf32>, vector<32x22xf32> -> vector<32x22xf32>
    %105 = vector.extract_strided_slice %104 {offsets = [0, 3], sizes = [32, 16], strides = [1, 1]} : vector<32x22xf32> to vector<32x16xf32>
    %cst_69 = arith.constant dense<0xFF800000> : vector<32xf32>
    %106 = vector.multi_reduction <maximumf>, %105, %cst_69 [1] : vector<32x16xf32> to vector<32xf32>
    %107 = vector.shape_cast %106 : vector<32xf32> to vector<32x1xf32>
    %108 = arith.addf %107, %36 : vector<32x1xf32>
    %c0_70 = arith.constant 0 : index
    %c0_71 = arith.constant 0 : index
    %109 = vector.load %arg7[%c0_70, %c0_71] : memref<32x96xf32, #tpu.memory_space<vmem>>, vector<32x32xf32>
    %cst_72 = arith.constant dense<0.000000e+00> : vector<32x1xf32>
    %110 = tpu.matmul %109, %68, %cst_72 {dimension_numbers = #tpu.dot_dimension_numbers<[1], [0], [0], [1], [0, 0, 1, 1], [], []>} : vector<32x32xf32>, vector<32x1xf32>, vector<32x1xf32> -> vector<32x1xf32>
    %c0_73 = arith.constant 0 : index
    %c32_74 = arith.constant 32 : index
    %111 = vector.load %arg7[%c0_73, %c32_74] : memref<32x96xf32, #tpu.memory_space<vmem>>, vector<32x32xf32>
    %cst_75 = arith.constant dense<0.000000e+00> : vector<32x1xf32>
    %112 = tpu.matmul %111, %94, %cst_75 {dimension_numbers = #tpu.dot_dimension_numbers<[1], [0], [0], [1], [0, 0, 1, 1], [], []>} : vector<32x32xf32>, vector<32x1xf32>, vector<32x1xf32> -> vector<32x1xf32>
    %113 = arith.addf %110, %112 : vector<32x1xf32>
    %c0_76 = arith.constant 0 : index
    %c64 = arith.constant 64 : index
    %114 = vector.load %arg7[%c0_76, %c64] : memref<32x96xf32, #tpu.memory_space<vmem>>, vector<32x32xf32>
    %cst_77 = arith.constant dense<0.000000e+00> : vector<32x1xf32>
    %115 = tpu.matmul %114, %108, %cst_77 {dimension_numbers = #tpu.dot_dimension_numbers<[1], [0], [0], [1], [0, 0, 1, 1], [], []>} : vector<32x32xf32>, vector<32x1xf32>, vector<32x1xf32> -> vector<32x1xf32>
    %116 = arith.addf %113, %115 : vector<32x1xf32>
    %117 = arith.addf %116, %37 : vector<32x1xf32>
    %cst_78 = arith.constant dense<0.000000e+00> : vector<1xf32>
    %118 = vector.multi_reduction <add>, %117, %cst_78 [0] : vector<32x1xf32> to vector<1xf32>
    %119 = vector.shape_cast %118 : vector<1xf32> to vector<1x1xf32>
    %cst_79 = arith.constant 3.200000e+01 : f32
    %120 = vector.broadcast %cst_79 : f32 to vector<1x1xf32>
    %121 = arith.divf %119, %120 : vector<1x1xf32>
    %122 = vector.broadcast %121 : vector<1x1xf32> to vector<32x1xf32>
    %123 = arith.subf %117, %122 : vector<32x1xf32>
    %124 = arith.mulf %123, %123 : vector<32x1xf32>
    %cst_80 = arith.constant dense<0.000000e+00> : vector<1xf32>
    %125 = vector.multi_reduction <add>, %124, %cst_80 [0] : vector<32x1xf32> to vector<1xf32>
    %126 = vector.shape_cast %125 : vector<1xf32> to vector<1x1xf32>
    %cst_81 = arith.constant 3.200000e+01 : f32
    %127 = vector.broadcast %cst_81 : f32 to vector<1x1xf32>
    %128 = arith.divf %126, %127 : vector<1x1xf32>
    %129 = vector.broadcast %121 : vector<1x1xf32> to vector<32x1xf32>
    %130 = arith.subf %117, %129 : vector<32x1xf32>
    %cst_82 = arith.constant 9.99999974E-6 : f32
    %131 = vector.broadcast %cst_82 : f32 to vector<1x1xf32>
    %132 = arith.addf %128, %131 : vector<1x1xf32>
    %133 = math.rsqrt %132 : vector<1x1xf32>
    %134 = vector.broadcast %133 : vector<1x1xf32> to vector<32x1xf32>
    %135 = arith.mulf %130, %134 : vector<32x1xf32>
    %136 = arith.mulf %135, %38 : vector<32x1xf32>
    %137 = arith.addf %136, %39 : vector<32x1xf32>
    %cst_83 = arith.constant 5.000000e-01 : f32
    %138 = vector.broadcast %cst_83 : f32 to vector<32x1xf32>
    %139 = arith.mulf %138, %137 : vector<32x1xf32>
    %cst_84 = arith.constant 0.707106769 : f32
    %140 = vector.broadcast %cst_84 : f32 to vector<32x1xf32>
    %141 = arith.mulf %137, %140 : vector<32x1xf32>
    %142 = math.absf %141 : vector<32x1xf32>
    %cst_85 = arith.constant 0.327591091 : f32
    %143 = vector.broadcast %cst_85 : f32 to vector<32x1xf32>
    %144 = arith.mulf %143, %142 : vector<32x1xf32>
    %cst_86 = arith.constant 1.000000e+00 : f32
    %145 = vector.broadcast %cst_86 : f32 to vector<32x1xf32>
    %146 = arith.addf %145, %144 : vector<32x1xf32>
    %cst_87 = arith.constant 1.000000e+00 : f32
    %147 = vector.broadcast %cst_87 : f32 to vector<32x1xf32>
    %148 = arith.divf %147, %146 : vector<32x1xf32>
    %cst_88 = arith.constant 1.06140542 : f32
    %149 = vector.broadcast %cst_88 : f32 to vector<32x1xf32>
    %150 = arith.mulf %148, %149 : vector<32x1xf32>
    %cst_89 = arith.constant -1.45315206 : f32
    %151 = vector.broadcast %cst_89 : f32 to vector<32x1xf32>
    %152 = arith.addf %151, %150 : vector<32x1xf32>
    %153 = arith.mulf %148, %152 : vector<32x1xf32>
    %cst_90 = arith.constant 1.42141378 : f32
    %154 = vector.broadcast %cst_90 : f32 to vector<32x1xf32>
    %155 = arith.addf %154, %153 : vector<32x1xf32>
    %156 = arith.mulf %148, %155 : vector<32x1xf32>
    %cst_91 = arith.constant -0.284496725 : f32
    %157 = vector.broadcast %cst_91 : f32 to vector<32x1xf32>
    %158 = arith.addf %157, %156 : vector<32x1xf32>
    %159 = arith.mulf %148, %158 : vector<32x1xf32>
    %cst_92 = arith.constant 0.254829586 : f32
    %160 = vector.broadcast %cst_92 : f32 to vector<32x1xf32>
    %161 = arith.addf %160, %159 : vector<32x1xf32>
    %162 = arith.mulf %148, %161 : vector<32x1xf32>
    %cst_93 = arith.constant 0.000000e+00 : f32
    %163 = vector.broadcast %cst_93 : f32 to vector<32x1xf32>
    %164 = arith.subf %163, %142 : vector<32x1xf32>
    %165 = arith.mulf %164, %142 : vector<32x1xf32>
    %166 = math.exp %165 : vector<32x1xf32>
    %167 = arith.mulf %162, %166 : vector<32x1xf32>
    %cst_94 = arith.constant 1.000000e+00 : f32
    %168 = vector.broadcast %cst_94 : f32 to vector<32x1xf32>
    %169 = arith.subf %168, %167 : vector<32x1xf32>
    %cst_95 = arith.constant 0.000000e+00 : f32
    %170 = vector.broadcast %cst_95 : f32 to vector<32x1xf32>
    %171 = arith.cmpf olt, %141, %170 : vector<32x1xf32>
    %cst_96 = arith.constant 0.000000e+00 : f32
    %172 = vector.broadcast %cst_96 : f32 to vector<32x1xf32>
    %173 = arith.subf %172, %169 : vector<32x1xf32>
    %174 = arith.select %171, %173, %169 : vector<32x1xi1>, vector<32x1xf32>
    %cst_97 = arith.constant 1.000000e+00 : f32
    %175 = vector.broadcast %cst_97 : f32 to vector<32x1xf32>
    %176 = arith.addf %175, %174 : vector<32x1xf32>
    %177 = arith.mulf %139, %176 : vector<32x1xf32>
    %c0_98 = arith.constant 0 : index
    %c0_99 = arith.constant 0 : index
    %c0_100 = arith.constant 0 : index
    %178 = vector.load %arg9[%c0_98, %c0_99, %c0_100] : memref<1x32x1xf32, #tpu.memory_space<vmem>>, vector<1x32x1xf32>
    %179 = vector.shape_cast %178 : vector<1x32x1xf32> to vector<32x1xf32>
    %180 = vector.shape_cast %177 : vector<32x1xf32> to vector<1x32x1xf32>
    tpu.vector_store %arg9[%c0_98, %c0_99, %c0_100], %180 {strides = array<i32>} : memref<1x32x1xf32, #tpu.memory_space<vmem>>, vector<1x32x1xf32>,
    return
  }
  func.func @transform_0(%arg0: i32) -> (i32, i32, i32) {
    %c0_i32 = arith.constant 0 : i32
    %c0_i32_0 = arith.constant 0 : i32
    %c0_i32_1 = arith.constant 0 : i32
    return %arg0, %c0_i32, %c0_i32_0 : i32, i32, i32
  }
  func.func @transform_1(%arg0: i32) -> (i32, i32) {
    %c0_i32 = arith.constant 0 : i32
    %c0_i32_0 = arith.constant 0 : i32
    %c0_i32_1 = arith.constant 0 : i32
    return %c0_i32, %c0_i32_0 : i32, i32
  }
  func.func @transform_2(%arg0: i32) -> (i32, i32) {
    %c0_i32 = arith.constant 0 : i32
    %c0_i32_0 = arith.constant 0 : i32
    %c0_i32_1 = arith.constant 0 : i32
    return %c0_i32, %c0_i32_0 : i32, i32
  }
  func.func @transform_3(%arg0: i32) -> (i32, i32) {
    %c0_i32 = arith.constant 0 : i32
    %c0_i32_0 = arith.constant 0 : i32
    %c0_i32_1 = arith.constant 0 : i32
    return %c0_i32, %c0_i32_0 : i32, i32
  }
  func.func @transform_4(%arg0: i32) -> (i32, i32) {
    %c0_i32 = arith.constant 0 : i32
    %c0_i32_0 = arith.constant 0 : i32
    %c0_i32_1 = arith.constant 0 : i32
    return %c0_i32, %c0_i32_0 : i32, i32
  }
  func.func @transform_5(%arg0: i32) -> (i32, i32) {
    %c0_i32 = arith.constant 0 : i32
    %c0_i32_0 = arith.constant 0 : i32
    %c0_i32_1 = arith.constant 0 : i32
    return %c0_i32, %c0_i32_0 : i32, i32
  }
  func.func @transform_6(%arg0: i32) -> (i32, i32) {
    %c0_i32 = arith.constant 0 : i32
    %c0_i32_0 = arith.constant 0 : i32
    %c0_i32_1 = arith.constant 0 : i32
    return %c0_i32, %c0_i32_0 : i32, i32
  }
  func.func @transform_7(%arg0: i32) -> (i32, i32) {
    %c0_i32 = arith.constant 0 : i32
    %c0_i32_0 = arith.constant 0 : i32
    %c0_i32_1 = arith.constant 0 : i32
    return %c0_i32, %c0_i32_0 : i32, i32
  }
  func.func @transform_8(%arg0: i32) -> (i32, i32, i32) {
    %c0_i32 = arith.constant 0 : i32
    %c0_i32_0 = arith.constant 0 : i32
    %c0_i32_1 = arith.constant 0 : i32
    return %arg0, %c0_i32, %c0_i32_0 : i32, i32, i32
  }
}

</mosaic_0001>

<bundles_post_ra>
// kernel: aggregator_forward.1
= control target key start
LH: loop header
LB: loop body
LE: loop exit
PB: predicated region body
PF: predicated region fallthrough
CT: control target
= control target key end

     0   :  { %s2080_s27 = smov 0   ;;  %s2693_s0 = inlined_call_operand.vmem [shape: f32[2,32,16], index: 0, kind: input, shape index: {}]   ;;  %s2694_s1 = inlined_call_operand.vmem [shape: f32[4,32], index: 1, kind: input, shape index: {}]   ;;  %s2695_s2 = inlined_call_operand.vmem [shape: f32[32,32], index: 2, kind: input, shape index: {}]   ;;  %s2696_s3 = inlined_call_operand.vmem [shape: f32[32,32], index: 3, kind: input, shape index: {}]   ;;  %s2697_s4 = inlined_call_operand.vmem [shape: f32[32,64], index: 4, kind: input, shape index: {}]   ;;  %s2698_s5 = inlined_call_operand.vmem [shape: f32[32,224], index: 5, kind: input, shape index: {}]   ;;  %s2699_s6 = inlined_call_operand.vmem [shape: f32[32,96], index: 6, kind: input, shape index: {}]   ;;  %s2700_s7 = inlined_call_operand.vmem [shape: f32[32,12], index: 7, kind: input, shape index: {}]   ;;  %s2701_s8 = inlined_call_operand.vmem [shape: f32[2,32,1], index: 8, kind: output, shape index: {}]  }
   0x1 LB: > { %s1782_s28 = sadd.s32 4294967295, %s2018_s27   ;;  %p1786_p0 = scmp.ge.s32.totalorder %s2018_s27, 1  ;;  %s2018_s27 = sphi %s2080_s27, %s18_s27  }
   0x2   : > { %p262_p1 = scmp.lt.s32.totalorder %s2018_s27, 3 }
   0x4   : > { %p263_p2 = pnand %p1786_p0, %p262_p1 }
   0x5   : > { %p296_p3 = scmp.lt.s32.totalorder (!%p263_p2), %s1782_s28, 1  ;;  %s2021_s11 = smov (!%p263_p2), 6  }
   0x6   : > { %266 = sbr.rel (%p263_p2) target bundleno = 2065 (0x811), region = 52  ;;  %s2022_s12 = smov (!%p263_p2), 125  }
   0x7   : > { %s2024_s25 = smov (!%p263_p2), 120   ;;  %s2026_s14 = smov (!%p263_p2), 3  }
   0x8   : > { %s2027_s15 = smov (!%p263_p2), 126   ;;  %s2028_s16 = smov (!%p263_p2), 122  }
   0x9   : > { %s2029_s17 = smov (!%p263_p2), 127   ;;  %s2030_s18 = smov (!%p263_p2), 123  }
   0xa   : > { %s2031_s19 = smov (!%p263_p2), 124   ;;  %s2032_s22 = smov (!%p263_p2), 96  }
   0xb   : > { %vm306_vm0 = vcmask 23552   ;;  %vm311_vm1 = vcmask 228552   ;;  %vm316_vm2 = vcmask 48152   ;;  %v2020_v0 = vmov 0.0   ;;  %s2717_s28 = smov (!%p296_p3, %s1782_s28), 1  ;;  %v524_v26 = vld [vmem:[%s2695_s2] sm:$0xff] }
   0xc   : > { %308 = vst.msk [vmem:[#allocation2 + $0x8] sm:$0xff] %vm306_vm0, %v2020_v0  ;;  %s1873_s29 = sshll.u32 %s2717_s28, 5  ;;  %vm341_vm3 = vcmask 179248   ;;  %vm346_vm4 = vcmask 203952   ;;  %v355_v15 = vlaneseq  ;;  %v391_v25 = vld [vmem:[%s2694_s1] sm:$0xf] }
   0xd   : > { %313 = vst.msk [vmem:[#allocation2 + $0x8] sm:$0xff] %vm311_vm1, %v2020_v0  ;;  %s300_s10 = scalar_lea.vmem %s2693_s0, %s1873_s29  ;;  %vm408_vm8 = vcmask 261120   ;;  %vm472_vm11 = vcmask 1045504   ;;  %v2023_v31 = vmov 1.0   ;;  %v525_v32 = vld [vmem:[%s2695_s2 + $0x8] sm:$0xff]  ;;  %v526_v33 = vld [vmem:[%s2695_s2 + $0x10] sm:$0xff] }
   0xe   : > { %318 = vst.msk [vmem:[#allocation2 + $0x8] sm:$0xff] %vm316_vm2, %v2020_v0  ;;  %v322_v1 = vld [vmem:[%s300_s10 + $0x8] sm:$0xff]  ;;  %v324_v2 = vld [vmem:[%s300_s10 + $0x18] sm:$0xff]  ;;  %v321_v3 = vld [vmem:[%s300_s10] sm:$0xff]  ;;  %v356_v16 = vshrl.u32 %v355_v15, 7  ;;  %v360_v17 = vand.u32 127, %v355_v15 }
   0xf   : > { %307 = vst.msk [vmem:[#allocation2] sm:$0xff] %vm306_vm0, %v2020_v0  ;;  %331 = vrot.lane.b32.xlu1 %v322_v1, %s2021_s11  ;;  %335 = vrot.lane.b32.xlu0 %v324_v2, %s2021_s11  ;;  %v323_v4 = vld [vmem:[%s300_s10 + $0x10] sm:$0xff]  ;;  %v2249_v56 = vld [vmem:[%s2700_s7 + $0x8] sm:$0xff]  ;;  %v2025_v58 = vmov 0  }
  0x10   : > { %309 = vst.msk [vmem:[#allocation2 + $0x10] sm:$0xff] %vm306_vm0, %v2020_v0  ;;  %v358_v18 = vadd.s32 16, %v356_v16  ;;  %v361_v19 = vmul.u32 22, %v360_v17  ;;  %v357_v21 = vadd.s32 8, %v356_v16  ;;  %v380_v40 = vmul.u32 22, %v356_v16  ;;  %v2254_v57 = vld [vmem:[%s2700_s7] sm:$0xff]  ;;  %1902 = vset.pattern.permute.xlu1 %v2025_v58  ;;  %1903 = vset.pattern.permute.xlu0 %v2025_v58 }
  0x11   : > { %310 = vst.msk [vmem:[#allocation2 + $0x18] sm:$0xff] %vm306_vm0, %v2020_v0  ;;  %vm468_vm0 = vcmask 179200   ;;  %v2261_v59 = vld [vmem:[%s2700_s7 + $0x18] sm:$0xff]  ;;  %v2266_v60 = vld [vmem:[%s2700_s7 + $0x10] sm:$0xff] }
  0x12   : > { %312 = vst.msk [vmem:[#allocation2] sm:$0xff] %vm311_vm1, %v2020_v0  ;;  %v364_v20 = vsub.s32 %v358_v18, %v361_v19  ;;  %v363_v23 = vsub.s32 %v357_v21, %v361_v19  ;;  %v362_v24 = vsub.s32 %v356_v16, %v361_v19  ;;  %v381_v41 = vsub.s32 %v360_v17, %v380_v40 }
  0x13   : > { %317 = vst.msk [vmem:[#allocation2] sm:$0xff] %vm316_vm2, %v2020_v0 }
  0x14   : > { %314 = vst.msk [vmem:[#allocation2 + $0x10] sm:$0xff] %vm311_vm1, %v2020_v0  ;;  %vm367_vm5 = vcmp.ge.s32.totalorder %v364_v20, 3  ;;  %vm370_vm6 = vcmp.lt.s32.totalorder %v364_v20, 19  ;;  %vm366_vm9 = vcmp.ge.s32.totalorder %v363_v23, 3  ;;  %vm369_vm10 = vcmp.lt.s32.totalorder %v363_v23, 19 }
  0x15   : > { %315 = vst.msk [vmem:[#allocation2 + $0x18] sm:$0xff] %vm311_vm1, %v2020_v0  ;;  %vm373_vm7 = vmand %vm367_vm5, %vm370_vm6  ;;  %vm365_vm12 = vcmp.ge.s32.totalorder %v362_v24, 3  ;;  %vm368_vm13 = vcmp.lt.s32.totalorder %v362_v24, 19  ;;  %vm432_vm1 = vcmask 150552   ;;  %vm436_vm6 = vcmask 7168  }
  0x16   : > { %319 = vst.msk [vmem:[#allocation2 + $0x10] sm:$0xff] %vm316_vm2, %v2020_v0  ;;  %v2161_v28 = vsel %vm373_vm7, 1.0, %v2020_v0  ;;  %vm2167_vm14 = vmand %vm366_vm9, %vm369_vm10  ;;  %vm606_vm7 = vcmask 1043456   ;;  %vm597_vm9 = vcmask 31744   ;;  %vm1214_vm10 = vcmask 785408  }
  0x17   : > { %320 = vst.msk [vmem:[#allocation2 + $0x18] sm:$0xff] %vm316_vm2, %v2020_v0  ;;  %329 = vrot.lane.b32.xlu1 %v321_v3, %s2021_s11  ;;  %333 = vrot.lane.b32.xlu0 %v323_v4, %s2021_s11  ;;  %vm2173_vm15 = vmand %vm365_vm12, %vm368_vm13  ;;  %vm382_vm2 = vcmp.ge.s32.totalorder %v381_v41, 0  ;;  %s2033_s11 = smov 64  }
  0x81   : > { %v332_v5 = vpop.permute.xlu1 %331  ;;  %v336_v6 = vpop.permute.xlu0 %335 }
  0x82   : > { %343 = vst.msk [vmem:[#allocation2 + $0x8] sm:$0xff] %vm341_vm3, %v332_v5 }
  0x83   : > { %348 = vst.msk [vmem:[#allocation2 + $0x8] sm:$0xff] %vm346_vm4, %v2020_v0 }
  0x84   : > { %345 = vst.msk [vmem:[#allocation2 + $0x18] sm:$0xff] %vm341_vm3, %v336_v6 }
  0x85   : > { %350 = vst.msk [vmem:[#allocation2 + $0x18] sm:$0xff] %vm346_vm4, %v2020_v0 }
  0x89   : > { %v330_v7 = vpop.permute.xlu1 %329  ;;  %v334_v8 = vpop.permute.xlu0 %333 }
  0x8a   : > { %342 = vst.msk [vmem:[#allocation2] sm:$0xff] %vm341_vm3, %v330_v7  ;;  %v2120_v9 = vld [vmem:[#allocation2 + $0x8] sm:$0xff] }
  0x8b   : > { %347 = vst.msk [vmem:[#allocation2] sm:$0xff] %vm346_vm4, %v2020_v0  ;;  %398 = vrot.lane.b32.xlu0 %v2120_v9, %s2022_s12 }
  0x8c   : > { %344 = vst.msk [vmem:[#allocation2 + $0x10] sm:$0xff] %vm341_vm3, %v334_v8  ;;  %v2126_v10 = vld [vmem:[#allocation2 + $0x18] sm:$0xff]  ;;  %vm383_vm3 = vcmp.lt.s32.totalorder %v381_v41, 22 }
  0x8d   : > { %349 = vst.msk [vmem:[#allocation2 + $0x10] sm:$0xff] %vm346_vm4, %v2020_v0  ;;  %402 = vrot.lane.b32.xlu2 %v2126_v10, %s2022_s12  ;;  %vm440_vm4 = vcmask 1040384   ;;  %vm384_vm5 = vmand %vm382_vm2, %vm383_vm3  ;;  %v527_v8 = vld [vmem:[%s2695_s2 + $0x18] sm:$0xff]  ;;  %vm1285_vm3 = vcmask 154648  }
  0x8e   : > { %v2206_v42 = vsel %vm384_vm5, 1.0, %v2020_v0 }
  0x8f   : > { %1796 = vmatpush.msk.msra.mxu2 %vm440_vm4, %v2206_v42 }
  0x91   : > { %1798 = vmatpush.msk.msrb.mxu2 %vm472_vm11, %v2161_v28 }
  0x92   : > { %v2132_v11 = vld [vmem:[#allocation2] sm:$0xff] }
  0x93   : > { %396 = vrot.lane.b32.xlu1 %v2132_v11, %s2022_s12  ;;  %1799 = vmatpush.msk.msrb.mxu2 %vm2167_vm14, %v2023_v31 }
  0x94   : > { %v2136_v12 = vld [vmem:[#allocation2 + $0x10] sm:$0xff]  ;;  %589 = vrot.lane.b32.xlu0 %v2254_v57, %s2024_s25 }
  0x95   : > { %400 = vrot.lane.b32.xlu2 %v2136_v12, %s2022_s12  ;;  %1800 = vmatpush.msk.msrb.mxu2 %vm2173_vm15, %v2023_v31 }
  0x9b   : > { %591 = vrot.lane.b32.xlu1 %v2249_v56, %s2024_s25 }
  0x9c   : > { %593 = vrot.lane.b32.xlu0 %v2266_v60, %s2024_s25 }
  0xa3   : > { %595 = vrot.lane.b32.xlu1 %v2261_v59, %s2024_s25 }
  0xab   : > { %530 = vperm.xlu1 %1902, %v2254_v57  }
  0xb3   : > { %535 = vperm.xlu1 %1902, %v2249_v56  }
  0xbb   : > { %540 = vperm.xlu1 %1902, %v2266_v60  }
  0xe7   : > { %v2140_v13 = vpop.permute.xlu2 %402 }
  0xe8   : > { %424 = vmatpush.msra.mxu0 %v2140_v13  ;;  %572 = vmatpush.msra.mxu1 %v2140_v13 }
  0xef   : > { %v2144_v14 = vpop.permute.xlu2 %400 }
  0xf0   : > { %425 = vmatpush.msra.mxu0 %v2144_v14  ;;  %573 = vmatpush.msra.mxu1 %v2144_v14 }
  0xfd   : > { %v2148_v22 = vpop.permute.xlu0 %398 }
  0xfe   : > { %426 = vmatpush.msra.mxu0 %v2148_v22  ;;  %574 = vmatpush.msra.mxu1 %v2148_v22 }
 0x105   : > { %v2158_v27 = vpop.permute.xlu1 %396 }
 0x106   : > { %427 = vmatpush.msra.mxu0 %v2158_v27  ;;  %575 = vmatpush.msra.mxu1 %v2158_v27  ;;  %v590_v4 = vpop.permute.xlu0 %589 }
 0x107   : > { %1795 = vmatmul.msk.f32.vlgmr.msra.gmra.mxu0 %vm408_vm8, %v391_v25  ;;  %1804 = vmatmul.msk.f32.vlgmr.msra.gmra.mxu1 %vm408_vm8, %v524_v26 }
 0x108   : > { %1824 = vmatpush.msk.msrb.mxu1 %vm472_vm11, %v2161_v28  ;;  %1802 = vmatpush.msk.msrb.mxu0 %vm440_vm4, %v2206_v42 }
 0x10a   : > { %1825 = vmatpush.msk.msrb.mxu1 %vm2167_vm14, %v2023_v31 }
 0x10c   : > { %1826 = vmatpush.msk.msrb.mxu1 %vm2173_vm15, %v2023_v31 }
 0x10d   : > { %v592_v5 = vpop.permute.xlu1 %591 }
 0x10e   : > { %v594_v6 = vpop.permute.xlu0 %593 }
 0x10f   : > { %1805 = vmatmul.msk.f32.gmra.mxu1 %vm408_vm8, %v525_v32 }
 0x115   : > { %v596_v7 = vpop.permute.xlu1 %595 }
 0x117   : > { %1806 = vmatmul.msk.f32.gmra.mxu1 %vm408_vm8, %v526_v33 }
 0x11f   : > { %1827 = vmatmul.msk.f32.vlgmr.msrb.gmra.mxu1 %vm468_vm0, %v2158_v27 }
 0x127   : > { %1828 = vmatmul.msk.f32.gmra.mxu1 %vm468_vm0, %v2148_v22 }
 0x12f   : > { %1829 = vmatmul.msk.f32.gmra.mxu1 %vm468_vm0, %v2144_v14 }
 0x137   : > { %1830 = vmatmul.msk.f32.gmra.mxu1 %vm468_vm0, %v2140_v13 }
 0x184   : > { %v429_v34 = vpop.f32.mrf.mxu0  ;;  %v2199_v35 = vpop.f32.mrf.mxu1 }
 0x185   : > { %v433_v36 = vsel %vm432_vm1, %v429_v34, -inf }
 0x186   : > { %434 = vmax.xlane.f32.xlu2 %v433_v36 }
 0x18c   : > { %v2201_v37 = vpop.f32.mrf.mxu1 }
 0x194   : > { %v2203_v38 = vpop.f32.mrf.mxu1 }
 0x19c   : > { %v766_v39 = vpop.f32.mrf.mxu1 }
 0x19d   : > { %v2228_v49 = vmul.f32 0.0625, %v766_v39 }
 0x1a4   : > { %v769_v43 = vpop.f32.mrf.mxu1 }
 0x1a5   : > { %v2225_v48 = vmul.f32 0.0625, %v769_v43  ;;  %v1919_v43 = vpack.i.bf16 %v2132_v11, %v2120_v9 }
 0x1ac   : > { %v772_v44 = vpop.f32.mrf.mxu1 }
 0x1ad   : > { %v2222_v47 = vmul.f32 0.0625, %v772_v44 }
 0x1b4   : > { %v775_v45 = vpop.f32.mrf.mxu1 }
 0x1b5   : > { %v2220_v46 = vmul.f32 0.0625, %v775_v45 }
 0x1b7   : > { %1021 = vmatpush.msra.mxu1 %v2220_v46 }
 0x1b9   : > { %1022 = vmatpush.msra.mxu1 %v2222_v47 }
 0x1bb   : > { %1023 = vmatpush.msra.mxu1 %v2225_v48 }
 0x1bd   : > { %1024 = vmatpush.msra.mxu1 %v2228_v49 }
 0x1f9   : > { %v435_v50 = vpop.xlane.xlu2 %434 }
 0x1fa   : > { %1797 = vmatmul.msk.f32.vlgmr.msra.gmra.mxu2 %vm436_vm6, %v435_v50 }
 0x1fb   : > { %1875 = vmatpush.msra.mxu2 %v2140_v13 }
 0x1fd   : > { %1876 = vmatpush.msra.mxu2 %v2144_v14 }
 0x1ff   : > { %1877 = vmatpush.msra.mxu2 %v2148_v22 }
 0x201   : > { %1878 = vmatpush.msra.mxu2 %v2158_v27 }
 0x27d   : > { %v461_v51 = vpop.f32.mrf.mxu2 }
 0x27e   : > { %v464_v52 = vsub.f32 %v429_v34, %v461_v51 }
 0x280   : > { %v465_v53 = vmin.f32 %v464_v52, 0.0 }
 0x282   : > { %v466_v54 = vmul.f32 1.442695, %v465_v53 }
 0x284   : > { %1964 = vpow2.f32 %v466_v54 }
 0x28a   : > { %v1965_v55 = vpop.eup %1964 }
 0x28b   : > { %1801 = vmatmul.msk.f32.vlgmr.msrb.gmra.mxu2 %vm468_vm0, %v1965_v55 }
 0x28c   : > { %1813 = vmatpush.msk.msrb.mxu2 %vm472_vm11, %v2161_v28 }
 0x28e   : > { %1814 = vmatpush.msk.msrb.mxu2 %vm2167_vm14, %v2023_v31 }
 0x290   : > { %1815 = vmatpush.msk.msrb.mxu2 %vm2173_vm15, %v2023_v31 }
 0x293   : > { %1807 = vmatmul.msk.f32.vlgmr.msra.gmra.mxu2 %vm408_vm8, %v527_v8 }
 0x294   : > { %1836 = vmatpush.msk.msra.mxu2 %vm472_vm11, %v2161_v28 }
 0x296   : > { %1837 = vmatpush.msk.msra.mxu2 %vm2167_vm14, %v2023_v31 }
 0x298   : > { %1838 = vmatpush.msk.msra.mxu2 %vm2173_vm15, %v2023_v31 }
 0x30e   : > { %v493_v61 = vpop.f32.mrf.mxu2 }
 0x30f   : > { %1966 = vrcp.f32 %v493_v61 }
 0x315   : > { %v1967_v62 = vpop.eup %1966 }
 0x316   : > { %v497_v63 = vmul.f32 %v1967_v62, %v493_v61  ;;  %v586_v44 = vpop.f32.mrf.mxu2 }
 0x318   : > { %v498_v0 = vsub.f32 2.0, %v497_v63 }
 0x31a   : > { %v499_v1 = vmul.f32 %v1967_v62, %v498_v0 }
 0x31c   : > { %1803 = vmatmul.msk.f32.vlgmr.msrb.gmra.mxu0 %vm436_vm6, %v499_v1 }
 0x399   : > { %v520_v2 = vpop.f32.mrf.mxu0 }
 0x39a   : > { %v523_v3 = vmul.f32 %v1965_v55, %v520_v2 }
 0x39c   : > { %1808 = vmatpush.msk.msra.mxu3 %vm606_vm7, %v523_v3 }
 0x39d   : > { %1809 = vmatmul.msk.f32.vlgmr.msra.gmra.mxu3 %vm597_vm9, %v590_v4 }
 0x39e   : > { %1831 = vmatpush.msk.msrb.mxu3 %vm440_vm4, %v2206_v42 }
 0x3a0   : > { %1227 = vmatpush.msra.mxu3 %v2140_v13  ;;  %v531_v13 = vpop.permute.xlu1 %530 }
 0x3a2   : > { %1228 = vmatpush.msra.mxu3 %v2144_v14  ;;  %v578_v14 = vadd.f32 %v2199_v35, %v531_v13 }
 0x3a4   : > { %1229 = vmatpush.msra.mxu3 %v2148_v22 }
 0x3a5   : > { %1810 = vmatmul.msk.f32.gmra.mxu3 %vm597_vm9, %v592_v5 }
 0x3a6   : > { %1230 = vmatpush.msra.mxu3 %v2158_v27 }
 0x3a8   : > { %v536_v17 = vpop.permute.xlu1 %535 }
 0x3a9   : > { %v581_v18 = vadd.f32 %v2201_v37, %v536_v17  ;;  %v1904_v37 = vpack.i.bf16 %v2136_v12, %v2126_v10 }
 0x3ad   : > { %1811 = vmatmul.msk.f32.gmra.mxu3 %vm597_vm9, %v594_v6 }
 0x3b0   : > { %v541_v21 = vpop.permute.xlu1 %540 }
 0x3b1   : > { %v584_v22 = vadd.f32 %v2203_v38, %v541_v21 }
 0x3b5   : > { %1812 = vmatmul.msk.f32.gmra.mxu3 %vm597_vm9, %v596_v7 }
 0x3bd   : > { %1832 = vmatmul.msk.f32.vlgmr.msrb.gmra.mxu3 %vm436_vm6, %v2228_v49 }
 0x3c5   : > { %1833 = vmatmul.msk.f32.gmra.mxu3 %vm436_vm6, %v2225_v48 }
 0x3cd   : > { %1834 = vmatmul.msk.f32.gmra.mxu3 %vm436_vm6, %v2222_v47 }
 0x3d5   : > { %1835 = vmatmul.msk.f32.gmra.mxu3 %vm436_vm6, %v2220_v46 }
 0x420   : > { %v627_v15 = vpop.f32.mrf.mxu3 }
 0x421   : > { %v639_v16 = vmul.f32 %v627_v15, %v578_v14 }
 0x423   : > { %1816 = vmatmul.msk.f32.vlgmr.msrb.gmra.mxu2 %vm468_vm0, %v639_v16 }
 0x428   : > { %v630_v19 = vpop.f32.mrf.mxu3 }
 0x429   : > { %v640_v20 = vmul.f32 %v630_v19, %v581_v18 }
 0x42b   : > { %1817 = vmatmul.msk.f32.gmra.mxu2 %vm468_vm0, %v640_v20 }
 0x430   : > { %v633_v23 = vpop.f32.mrf.mxu3 }
 0x431   : > { %v641_v24 = vmul.f32 %v633_v23, %v584_v22 }
 0x433   : > { %1818 = vmatmul.msk.f32.gmra.mxu2 %vm468_vm0, %v641_v24  ;;  %v948_v24 = vld [vmem:[%s2697_s4] sm:$0xff] }
 0x434   : > { %1847 = vmatmul.msk.f32.vlgmr.msra.gmra.mxu1 %vm408_vm8, %v948_v24 }
 0x438   : > { %v636_v25 = vpop.f32.mrf.mxu3 }
 0x440   : > { %v811_v26 = vpop.f32.mrf.mxu3 }
 0x441   : > { %827 = vrot.lane.b32.xlu0 %v811_v26, %s2026_s14 }
 0x448   : > { %v814_v27 = vpop.f32.mrf.mxu3 }
 0x449   : > { %829 = vrot.lane.b32.xlu0 %v814_v27, %s2026_s14 }
 0x450   : > { %v817_v28 = vpop.f32.mrf.mxu3 }
 0x451   : > { %831 = vrot.lane.b32.xlu0 %v817_v28, %s2026_s14 }
 0x458   : > { %v820_v29 = vpop.f32.mrf.mxu3 }
 0x459   : > { %545 = vperm.xlu0 %1903, %v2261_v59   ;;  %833 = vrot.lane.b32.xlu2 %v820_v29, %s2026_s14 }
 0x461   : > { %1905 = vrot.lane.b32.xlu2 %v1904_v37, %s2027_s15 }
 0x469   : > { %1920 = vrot.lane.b32.xlu2 %v1919_v43, %s2028_s16 }
 0x471   : > { %1935 = vrot.lane.b32.xlu2 %v1919_v43, %s2029_s17 }
 0x479   : > { %1950 = vrot.lane.b32.xlu2 %v1919_v43, %s2031_s19 }
 0x4a6   : > { %v672_v61 = vpop.f32.mrf.mxu2 }
 0x4ae   : > { %v675_v1 = vpop.f32.mrf.mxu2 }
 0x4b3   : > { %v828_v30 = vpop.permute.xlu0 %827  ;;  %v834_v36 = vpop.permute.xlu2 %833 }
 0x4b4   : > { %v839_v31 = vsub.f32 %v2132_v11, %v828_v30  ;;  %v842_v38 = vsub.f32 %v2126_v10, %v834_v36  ;;  %v1207_v36 = vld [vmem:[%s2698_s5 + $0x8] sm:$0xff] }
 0x4b6   : > { %v843_v32 = vmul.f32 %v839_v31, %v839_v31  ;;  %v846_v41 = vmul.f32 %v842_v38, %v842_v38  ;;  %v678_v16 = vpop.f32.mrf.mxu2  ;;  %v1210_v38 = vld [vmem:[%s2698_s5 + $0x20] sm:$0xff] }
 0x4b8   : > { %851 = vrot.lane.b32.xlu1 %v843_v32, %s2022_s12  ;;  %v949_v32 = vld [vmem:[%s2697_s4 + $0x8] sm:$0xff] }
 0x4b9   : > { %1848 = vmatmul.msk.f32.gmra.mxu1 %vm408_vm8, %v949_v32 }
 0x4bb   : > { %v830_v33 = vpop.permute.xlu0 %829  ;;  %v1906_v52 = vpop.permute.xlu2 %1905 }
 0x4bc   : > { %v840_v34 = vsub.f32 %v2120_v9, %v830_v33  ;;  %v1908_v53 = vunpack.i.h.bf16 %v1906_v52  ;;  %v1907_v54 = vunpack.i.l.bf16 %v1906_v52 }
 0x4be   : > { %v844_v35 = vmul.f32 %v840_v34, %v840_v34  ;;  %1231 = vmatpush.msra.mxu3 %v1907_v54 }
 0x4c0   : > { %853 = vrot.lane.b32.xlu1 %v844_v35, %s2022_s12  ;;  %1232 = vmatpush.msra.mxu3 %v1908_v53  ;;  %v1206_v35 = vld [vmem:[%s2698_s5] sm:$0xff] }
 0x4c3   : > { %v832_v39 = vpop.permute.xlu0 %831  ;;  %v1921_v0 = vpop.permute.xlu2 %1920 }
 0x4c4   : > { %v841_v40 = vsub.f32 %v2136_v12, %v832_v39  ;;  %v1922_v8 = vunpack.i.l.bf16 %v1921_v0  ;;  %v1923_v13 = vunpack.i.h.bf16 %v1921_v0  ;;  %v1211_v39 = vld [vmem:[%s2698_s5 + $0x28] sm:$0xff] }
 0x4c6   : > { %v845_v42 = vmul.f32 %v841_v40, %v841_v40  ;;  %v1212_v40 = vld [vmem:[%s2698_s5 + $0x30] sm:$0xff] }
 0x4c8   : > { %855 = vrot.lane.b32.xlu0 %v845_v42, %s2022_s12  ;;  %857 = vrot.lane.b32.xlu1 %v846_v41, %s2022_s12  ;;  %v1213_v41 = vld [vmem:[%s2698_s5 + $0x38] sm:$0xff]  ;;  %v684_v42 = vld [vmem:[%s2696_s3] sm:$0xff] }
 0x4cb   : > { %v546_v45 = vpop.permute.xlu0 %545  ;;  %v1936_v15 = vpop.permute.xlu2 %1935 }
 0x4cc   : > { %v587_v50 = vadd.f32 %v586_v44, %v546_v45  ;;  %v1937_v22 = vunpack.i.l.bf16 %v1936_v15  ;;  %v1938_v23 = vunpack.i.h.bf16 %v1936_v15  ;;  %v686_v45 = vld [vmem:[%s2696_s3 + $0x10] sm:$0xff] }
 0x4ce   : > { %v642_v51 = vmul.f32 %v636_v25, %v587_v50 }
 0x4d0   : > { %1910 = vrot.lane.b32.xlu0 %v1904_v37, %s2028_s16  ;;  %1819 = vmatmul.msk.f32.gmra.mxu2 %vm468_vm0, %v642_v51  ;;  %v687_v51 = vld [vmem:[%s2696_s3 + $0x18] sm:$0xff] }
 0x4d1   : > { %1915 = vrot.lane.b32.xlu1 %v1919_v43, %s2027_s15 }
 0x4d3   : > { %v1951_v31 = vpop.permute.xlu2 %1950 }
 0x4d4   : > { %v1952_v34 = vunpack.i.l.bf16 %v1951_v31 }
 0x4d8   : > { %1925 = vrot.lane.b32.xlu0 %v1904_v37, %s2029_s17 }
 0x4d9   : > { %1930 = vrot.lane.b32.xlu1 %v1904_v37, %s2030_s18 }
 0x4e0   : > { %1940 = vrot.lane.b32.xlu0 %v1919_v43, %s2030_s18  ;;  %v685_v43 = vld [vmem:[%s2696_s3 + $0x8] sm:$0xff] }
 0x4e1   : > { %1945 = vrot.lane.b32.xlu1 %v1904_v37, %s2031_s19  ;;  %v1209_v37 = vld [vmem:[%s2698_s5 + $0x18] sm:$0xff] }
 0x4e8   : > { %956 = vrot.lane.b32.xlu0 %v948_v24, %s2032_s22 }
 0x4e9   : > { %958 = vrot.lane.b32.xlu1 %v949_v32, %s2032_s22 }
 0x4f1   : > { %1040 = vrot.lane.b32.xlu1 %v2249_v56, %s2027_s15 }
 0x52a   : > { %v852_v55 = vpop.permute.xlu1 %851 }
 0x52b   : > { %1839 = vmatmul.msk.f32.vlgmr.msra.gmra.mxu2 %vm468_vm0, %v852_v55 }
 0x532   : > { %v854_v58 = vpop.permute.xlu1 %853 }
 0x533   : > { %1840 = vmatmul.msk.f32.gmra.mxu2 %vm468_vm0, %v854_v58 }
 0x53a   : > { %v856_v62 = vpop.permute.xlu0 %855  ;;  %v858_v63 = vpop.permute.xlu1 %857 }
 0x53b   : > { %1841 = vmatmul.msk.f32.gmra.mxu2 %vm468_vm0, %v856_v62 }
 0x542   : > { %v1911_v2 = vpop.permute.xlu0 %1910 }
 0x543   : > { %v1912_v3 = vunpack.i.l.bf16 %v1911_v2  ;;  %1842 = vmatmul.msk.f32.gmra.mxu2 %vm468_vm0, %v858_v63  ;;  %v1916_v4 = vpop.permute.xlu1 %1915  ;;  %v1913_v7 = vunpack.i.h.bf16 %v1911_v2 }
 0x544   : > { %v1918_v5 = vunpack.i.h.bf16 %v1916_v4  ;;  %v1917_v6 = vunpack.i.l.bf16 %v1916_v4 }
 0x545   : > { %1260 = vmatpush.msrb.mxu2 %v1912_v3 }
 0x546   : > { %1233 = vmatpush.msra.mxu3 %v1917_v6 }
 0x547   : > { %1261 = vmatpush.msrb.mxu2 %v1913_v7 }
 0x548   : > { %1234 = vmatpush.msra.mxu3 %v1918_v5 }
 0x549   : > { %1262 = vmatpush.msrb.mxu2 %v1922_v8 }
 0x54a   : > { %v1926_v14 = vpop.permute.xlu0 %1925 }
 0x54b   : > { %v1927_v17 = vunpack.i.l.bf16 %v1926_v14  ;;  %v1931_v18 = vpop.permute.xlu1 %1930  ;;  %1263 = vmatpush.msrb.mxu2 %v1923_v13  ;;  %v1928_v21 = vunpack.i.h.bf16 %v1926_v14 }
 0x54c   : > { %v1933_v19 = vunpack.i.h.bf16 %v1931_v18  ;;  %v1932_v20 = vunpack.i.l.bf16 %v1931_v18 }
 0x54d   : > { %1235 = vmatpush.msra.mxu3 %v1927_v17 }
 0x54e   : > { %1264 = vmatpush.msrb.mxu2 %v1932_v20 }
 0x54f   : > { %1236 = vmatpush.msra.mxu3 %v1928_v21 }
 0x550   : > { %1265 = vmatpush.msrb.mxu2 %v1933_v19 }
 0x551   : > { %1237 = vmatpush.msra.mxu3 %v1937_v22 }
 0x552   : > { %v1941_v25 = vpop.permute.xlu0 %1940 }
 0x553   : > { %v1942_v26 = vunpack.i.l.bf16 %v1941_v25  ;;  %v681_v27 = vpop.f32.mrf.mxu2  ;;  %1238 = vmatpush.msra.mxu3 %v1938_v23  ;;  %v1946_v28 = vpop.permute.xlu1 %1945  ;;  %v1943_v29 = vunpack.i.h.bf16 %v1941_v25 }
 0x554   : > { %724 = vmatpush.msra.mxu0 %v681_v27  ;;  %v1947_v30 = vunpack.i.l.bf16 %v1946_v28  ;;  %v1948_v33 = vunpack.i.h.bf16 %v1946_v28 }
 0x555   : > { %1266 = vmatpush.msrb.mxu2 %v1942_v26  ;;  %1239 = vmatpush.msra.mxu3 %v2126_v10  ;;  %v951_v10 = vld [vmem:[%s2697_s4 + $0x18] sm:$0xff] }
 0x556   : > { %725 = vmatpush.msra.mxu0 %v678_v16  ;;  %962 = vrot.lane.b32.xlu0 %v951_v10, %s2032_s22 }
 0x557   : > { %1267 = vmatpush.msrb.mxu2 %v1943_v29  ;;  %1240 = vmatpush.msra.mxu3 %v2136_v12  ;;  %v950_v12 = vld [vmem:[%s2697_s4 + $0x10] sm:$0xff] }
 0x558   : > { %726 = vmatpush.msra.mxu0 %v675_v1  ;;  %960 = vrot.lane.b32.xlu2 %v950_v12, %s2032_s22 }
 0x559   : > { %1268 = vmatpush.msrb.mxu2 %v1947_v30  ;;  %1241 = vmatpush.msra.mxu3 %v2120_v9  ;;  %v1953_v9 = vunpack.i.h.bf16 %v1951_v31 }
 0x55a   : > { %727 = vmatpush.msra.mxu0 %v672_v61  ;;  %1849 = vmatmul.msk.f32.gmra.mxu1 %vm408_vm8, %v950_v12 }
 0x55b   : > { %1269 = vmatpush.msrb.mxu2 %v1948_v33  ;;  %1242 = vmatpush.msra.mxu3 %v2132_v11  ;;  %v1208_v11 = vld [vmem:[%s2698_s5 + $0x10] sm:$0xff] }
 0x55c   : > { %1243 = vmatmul.f32.vlgmr.msra.gmra.mxu3 %v1206_v35  ;;  %1820 = vmatmul.msk.f32.vlgmr.msra.gmra.mxu0 %vm408_vm8, %v684_v42 }
 0x55d   : > { %1270 = vmatpush.msrb.mxu2 %v1952_v34 }
 0x55e   : > { %1042 = vrot.lane.b32.xlu0 %v2266_v60, %s2027_s15 }
 0x55f   : > { %1271 = vmatpush.msrb.mxu2 %v1953_v9 }
 0x560   : > { %1855 = vmatmul.msk.f32.vlgmr.msrb.gmra.mxu2 %vm1214_vm10, %v1207_v36  ;;  %1044 = vrot.lane.b32.xlu2 %v2261_v59, %s2027_s15 }
 0x562   : > { %1850 = vmatmul.msk.f32.gmra.mxu1 %vm408_vm8, %v951_v10 }
 0x564   : > { %1246 = vmatmul.f32.gmra.mxu3 %v1208_v11  ;;  %1821 = vmatmul.msk.f32.gmra.mxu0 %vm408_vm8, %v685_v43 }
 0x568   : > { %1856 = vmatmul.msk.f32.gmra.mxu2 %vm1214_vm10, %v1209_v37  ;;  %1038 = vrot.lane.b32.xlu2 %v2254_v57, %s2027_s15 }
 0x56c   : > { %1249 = vmatmul.f32.gmra.mxu3 %v1210_v38  ;;  %1822 = vmatmul.msk.f32.gmra.mxu0 %vm408_vm8, %v686_v45  ;;  %v957_v38 = vpop.permute.xlu0 %956 }
 0x570   : > { %1857 = vmatmul.msk.f32.gmra.mxu2 %vm1214_vm10, %v1211_v39 }
 0x574   : > { %1252 = vmatmul.f32.gmra.mxu3 %v1212_v40  ;;  %1823 = vmatmul.msk.f32.gmra.mxu0 %vm408_vm8, %v687_v51 }
 0x578   : > { %1858 = vmatmul.msk.f32.gmra.mxu2 %vm1214_vm10, %v1213_v41 }
 0x5ae   : > { %v884_v44 = vpop.f32.mrf.mxu2 }
 0x5af   : > { %v2410_v53 = vmul.f32 0.06666667, %v884_v44  ;;  %v959_v44 = vpop.permute.xlu1 %958 }
 0x5b1   : > { %vm907_vm0 = vcmp.eq.f32.partialorder %v2410_v53, inf  ;;  %v910_v37 = vand.u32 2147483648, %v2410_v53  ;;  %vm909_vm2 = vcmp.eq.f32.partialorder %v2410_v53, 0.0 }
 0x5b6   : > { %v887_v50 = vpop.f32.mrf.mxu2 }
 0x5b7   : > { %v897_v52 = vmul.f32 0.06666667, %v887_v50 }
 0x5b9   : > { %1968 = vrsqrt.f32 %v897_v52  ;;  %vm919_vm14 = vcmp.eq.f32.partialorder %v897_v52, inf  ;;  %v922_v12 = vand.u32 2147483648, %v897_v52  ;;  %vm921_vm1 = vcmp.eq.f32.partialorder %v897_v52, 0.0 }
 0x5ba   : > { %1970 = vrsqrt.f32 %v2410_v53 }
 0x5be   : > { %v890_v54 = vpop.f32.mrf.mxu2 }
 0x5bf   : > { %v898_v55 = vmul.f32 0.06666667, %v890_v54  ;;  %v1969_v58 = vpop.eup %1968 }
 0x5c0   : > { %v1971_v61 = vpop.eup %1970  ;;  %v913_v63 = vmul.f32 %v1969_v58, %v897_v52 }
 0x5c1   : > { %1972 = vrsqrt.f32 %v898_v55  ;;  %v901_v3 = vmul.f32 %v1971_v61, %v2410_v53  ;;  %vm931_vm12 = vcmp.eq.f32.partialorder %v898_v55, inf  ;;  %v934_v34 = vand.u32 2147483648, %v898_v55 }
 0x5c2   : > { %v914_v5 = vmul.f32 %v1969_v58, %v913_v63  ;;  %vm933_vm15 = vcmp.eq.f32.partialorder %v898_v55, 0.0 }
 0x5c3   : > { %v902_v7 = vmul.f32 %v1971_v61, %v901_v3 }
 0x5c4   : > { %v915_v8 = vmul.f32 0.5, %v914_v5  ;;  %v1041_v5 = vpop.permute.xlu1 %1040 }
 0x5c5   : > { %v903_v16 = vmul.f32 0.5, %v902_v7 }
 0x5c6   : > { %v893_v62 = vpop.f32.mrf.mxu2  ;;  %v916_v18 = vsub.f32 1.5, %v915_v8 }
 0x5c7   : > { %v1973_v0 = vpop.eup %1972  ;;  %v899_v1 = vmul.f32 0.06666667, %v893_v62  ;;  %v904_v21 = vsub.f32 1.5, %v903_v16 }
 0x5c8   : > { %v925_v2 = vmul.f32 %v1973_v0, %v898_v55  ;;  %v917_v23 = vmul.f32 %v1969_v58, %v916_v18  ;;  %v963_v62 = vpop.permute.xlu0 %962 }
 0x5c9   : > { %1974 = vrsqrt.f32 %v899_v1  ;;  %v905_v26 = vmul.f32 %v1971_v61, %v904_v21  ;;  %vm943_vm11 = vcmp.eq.f32.partialorder %v899_v1, inf  ;;  %v946_v29 = vand.u32 2147483648, %v899_v1 }
 0x5ca   : > { %v926_v4 = vmul.f32 %v1973_v0, %v925_v2  ;;  %v918_v28 = vmul.f32 %v917_v23, %v897_v52  ;;  %vm945_vm13 = vcmp.eq.f32.partialorder %v899_v1, 0.0 }
 0x5cb   : > { %v906_v32 = vmul.f32 %v905_v26, %v2410_v53 }
 0x5cc   : > { %v927_v6 = vmul.f32 0.5, %v926_v4  ;;  %v920_v35 = vsel %vm919_vm14, %v897_v52, %v918_v28 }
 0x5cd   : > { %v908_v36 = vsel %vm907_vm0, %v2410_v53, %v906_v32  ;;  %v2423_v11 = vsel %vm921_vm1, %v922_v12, %v920_v35  ;;  %v961_v53 = vpop.permute.xlu2 %960 }
 0x5ce   : > { %v928_v15 = vsub.f32 1.5, %v927_v6  ;;  %v2428_v40 = vsel %vm909_vm2, %v910_v37, %v908_v36 }
 0x5cf   : > { %v1975_v13 = vpop.eup %1974 }
 0x5d0   : > { %v937_v14 = vmul.f32 %v1975_v13, %v899_v1  ;;  %v929_v20 = vmul.f32 %v1973_v0, %v928_v15  ;;  %v1043_v8 = vpop.permute.xlu0 %1042 }
 0x5d2   : > { %v938_v17 = vmul.f32 %v1975_v13, %v937_v14  ;;  %v930_v25 = vmul.f32 %v929_v20, %v898_v55  ;;  %v2454_v14 = vld [vmem:[%s2699_s6] sm:$0xff] }
 0x5d4   : > { %v939_v19 = vmul.f32 0.5, %v938_v17  ;;  %v932_v31 = vsel %vm931_vm12, %v898_v55, %v930_v25 }
 0x5d5   : > { %v2418_v10 = vsel %vm933_vm15, %v934_v34, %v932_v31  ;;  %v1045_v7 = vpop.permute.xlu2 %1044 }
 0x5d6   : > { %v940_v22 = vsub.f32 1.5, %v939_v19 }
 0x5d8   : > { %v941_v24 = vmul.f32 %v1975_v13, %v940_v22  ;;  %v1026_v13 = vpop.f32.mrf.mxu1 }
 0x5d9   : > { %v2445_v2 = vpop.f32.mrf.mxu0 }
 0x5da   : > { %v942_v27 = vmul.f32 %v941_v24, %v899_v1  ;;  %v2466_v24 = vld [vmem:[%s2699_s6 + $0x8] sm:$0xff] }
 0x5dc   : > { %v944_v30 = vsel %vm943_vm11, %v899_v1, %v942_v27 }
 0x5dd   : > { %v2415_v33 = vsel %vm945_vm13, %v946_v29, %v944_v30  ;;  %v1039_v18 = vpop.permute.xlu2 %1038 }
 0x5de   : > { %984 = vmatpush.msrb.mxu0 %v2415_v33 }
 0x5df   : > { %v1244_v9 = vpop.f32.mrf.mxu3 }
 0x5e0   : > { %985 = vmatpush.msrb.mxu0 %v2418_v10  ;;  %v1029_v22 = vpop.f32.mrf.mxu1 }
 0x5e1   : > { %v2447_v3 = vpop.f32.mrf.mxu0 }
 0x5e2   : > { %986 = vmatpush.msrb.mxu0 %v2423_v11 }
 0x5e3   : > { %v1273_v39 = vpop.f32.mrf.mxu2 }
 0x5e4   : > { %v1274_v41 = vadd.f32 %v1273_v39, %v1244_v9  ;;  %987 = vmatpush.msrb.mxu0 %v2428_v40 }
 0x5e5   : > { %1843 = vmatmul.msk.f32.vlgmr.msrb.gmra.mxu0 %vm408_vm8, %v957_v38  ;;  %v2475_v38 = vld [vmem:[%s2699_s6 + $0x10] sm:$0xff] }
 0x5e6   : > { %v1286_v42 = vsel %vm1285_vm3, %v1274_v41, -inf }
 0x5e7   : > { %1287 = vmax.xlane.f32.xlu1 %v1286_v42  ;;  %v1247_v43 = vpop.f32.mrf.mxu3 }
 0x5e8   : > { %v1032_v31 = vpop.f32.mrf.mxu1 }
 0x5e9   : > { %v2449_v4 = vpop.f32.mrf.mxu0 }
 0x5eb   : > { %v1276_v45 = vpop.f32.mrf.mxu2 }
 0x5ec   : > { %v1277_v50 = vadd.f32 %v1276_v45, %v1247_v43 }
 0x5ed   : > { %1844 = vmatmul.msk.f32.gmra.mxu0 %vm408_vm8, %v959_v44 }
 0x5ee   : > { %v1289_v51 = vsel %vm1285_vm3, %v1277_v50, -inf }
 0x5ef   : > { %1290 = vmax.xlane.f32.xlu0 %v1289_v51  ;;  %v1250_v52 = vpop.f32.mrf.mxu3 }
 0x5f0   : > { %v1035_v51 = vpop.f32.mrf.mxu1 }
 0x5f1   : > { %v738_v6 = vpop.f32.mrf.mxu0 }
 0x5f3   : > { %v1279_v54 = vpop.f32.mrf.mxu2 }
 0x5f4   : > { %v1280_v55 = vadd.f32 %v1279_v54, %v1250_v52 }
 0x5f5   : > { %1845 = vmatmul.msk.f32.gmra.mxu0 %vm408_vm8, %v961_v53 }
 0x5f6   : > { %v1292_v58 = vsel %vm1285_vm3, %v1280_v55, -inf  ;;  %v2489_v55 = vld [vmem:[%s2699_s6 + $0x18] sm:$0xff] }
 0x5f7   : > { %1293 = vmax.xlane.f32.xlu2 %v1292_v58  ;;  %v1253_v61 = vpop.f32.mrf.mxu3 }
 0x5fb   : > { %v1282_v63 = vpop.f32.mrf.mxu2 }
 0x5fc   : > { %v1283_v0 = vadd.f32 %v1282_v63, %v1253_v61 }
 0x5fd   : > { %1846 = vmatmul.msk.f32.gmra.mxu0 %vm408_vm8, %v963_v62 }
 0x5fe   : > { %v1295_v1 = vsel %vm1285_vm3, %v1283_v0, -inf }
 0x5ff   : > { %1296 = vmax.xlane.f32.xlu1 %v1295_v1 }
 0x60f   : > { %694 = vrot.lane.b32.xlu2 %v2261_v59, %s2029_s17 }
 0x617   : > { %690 = vrot.lane.b32.xlu2 %v2249_v56, %s2029_s17 }
 0x618   : > { %692 = vrot.lane.b32.xlu1 %v2266_v60, %s2029_s17 }
 0x61f   : > { %1310 = vrot.lane.b32.xlu2 %v2454_v14, %s2032_s22 }
 0x620   : > { %1392 = vrot.lane.b32.xlu1 %v2454_v14, %s2033_s11 }
 0x627   : > { %1396 = vrot.lane.b32.xlu2 %v2475_v38, %s2033_s11 }
 0x628   : > { %1394 = vrot.lane.b32.xlu1 %v2466_v24, %s2033_s11 }
 0x62f   : > { %1316 = vrot.lane.b32.xlu2 %v2489_v55, %s2032_s22 }
 0x630   : > { %1314 = vrot.lane.b32.xlu1 %v2475_v38, %s2032_s22 }
 0x637   : > { %1461 = vrot.lane.b32.xlu2 %v2266_v60, %s2031_s19 }
 0x638   : > { %1457 = vrot.lane.b32.xlu1 %v2254_v57, %s2031_s19 }
 0x63f   : > { %1533 = vrot.lane.b32.xlu2 %v2249_v56, %s2030_s18 }
 0x640   : > { %1463 = vrot.lane.b32.xlu1 %v2261_v59, %s2031_s19 }
 0x647   : > { %1547 = vrot.lane.b32.xlu2 %v2254_v57, %s2028_s16 }
 0x648   : > { %1535 = vrot.lane.b32.xlu1 %v2266_v60, %s2030_s18 }
 0x64f   : > { %1553 = vrot.lane.b32.xlu2 %v2261_v59, %s2028_s16 }
 0x650   : > { %1549 = vrot.lane.b32.xlu1 %v2249_v56, %s2028_s16 }
 0x65a   : > { %v1288_v15 = vpop.xlane.xlu1 %1287 }
 0x65b   : > { %v1298_v19 = vadd.f32 %v1288_v15, %v2254_v57 }
 0x662   : > { %v989_v16 = vpop.f32.mrf.mxu0  ;;  %v1291_v17 = vpop.xlane.xlu0 %1290 }
 0x663   : > { %v1299_v20 = vadd.f32 %v1291_v17, %v2249_v56  ;;  %v1027_v21 = vadd.f32 %v1026_v13, %v989_v16 }
 0x665   : > { %v1954_v23 = vpack.i.bf16 %v1298_v19, %v1299_v20  ;;  %v1050_v25 = vadd.f32 %v1039_v18, %v1027_v21 }
 0x667   : > { %1955 = vrot.lane.b32.xlu0 %v1954_v23, %s2022_s12  ;;  %v1851_v29 = vmul.f32 -1.442695, %v1050_v25 }
 0x669   : > { %1976 = vpow2.f32 %v1851_v29 }
 0x66a   : > { %v992_v26 = vpop.f32.mrf.mxu0  ;;  %v1294_v28 = vpop.xlane.xlu2 %1293 }
 0x66b   : > { %v1030_v27 = vadd.f32 %v1029_v22, %v992_v26  ;;  %v1300_v12 = vadd.f32 %v1294_v28, %v2266_v60 }
 0x66d   : > { %v1051_v30 = vadd.f32 %v1041_v5, %v1030_v27 }
 0x66f   : > { %v1852_v32 = vmul.f32 -1.442695, %v1051_v30  ;;  %v1977_v43 = vpop.eup %1976 }
 0x670   : > { %v2484_v52 = vadd.f32 1.0, %v1977_v43 }
 0x671   : > { %1978 = vpow2.f32 %v1852_v32 }
 0x672   : > { %v995_v34 = vpop.f32.mrf.mxu0  ;;  %v1297_v35 = vpop.xlane.xlu1 %1296  ;;  %vm1075_vm5 = vweird.f32 %v2484_v52 }
 0x673   : > { %v1033_v9 = vadd.f32 %v1032_v31, %v995_v34  ;;  %v1301_v36 = vadd.f32 %v1297_v35, %v2261_v59  ;;  %v695_v37 = vpop.permute.xlu2 %694  ;;  %v1079_v34 = vand.u32 2147483647, %v2484_v52 }
 0x674   : > { %v739_v39 = vadd.f32 %v738_v6, %v695_v37 }
 0x675   : > { %v1052_v41 = vadd.f32 %v1043_v8, %v1033_v9  ;;  %v1959_v42 = vpack.i.bf16 %v1300_v12, %v1301_v36 }
 0x676   : > { %1375 = vmatpush.msrb.mxu1 %v739_v39 }
 0x677   : > { %v1979_v44 = vpop.eup %1978  ;;  %v1853_v45 = vmul.f32 -1.442695, %v1052_v41  ;;  %1960 = vrot.lane.b32.xlu0 %v1959_v42, %s2022_s12  ;;  %v1081_v42 = vand.u32 2147483648, %v2484_v52  ;;  %v2034_v41 = vmov 32.0  }
 0x678   : > { %v2482_v50 = vadd.f32 1.0, %v1979_v44 }
 0x679   : > { %1980 = vpow2.f32 %v1853_v45 }
 0x67a   : > { %v998_v53 = vpop.f32.mrf.mxu0  ;;  %1982 = vrcp.f32 %v2482_v50  ;;  %vm1090_vm11 = vweird.f32 %v2482_v50  ;;  %v1096_v32 = vand.u32 2147483648, %v2482_v50  ;;  %v1094_v9 = vand.u32 2147483647, %v2482_v50 }
 0x67b   : > { %v1036_v54 = vadd.f32 %v1035_v51, %v998_v53  ;;  %1984 = vrcp.f32 %v2484_v52  ;;  %v691_v15 = vpop.permute.xlu2 %690 }
 0x67c   : > { %v733_v20 = vadd.f32 %v2447_v3, %v691_v15  ;;  %v1097_v51 = vor.u32 1.1754944e-38, %v1096_v32  ;;  %vm1095_vm2 = vcmp.eq.f32.partialorder %v1094_v9, 8.507059e+37 }
 0x67d   : > { %v1053_v58 = vadd.f32 %v1045_v7, %v1036_v54 }
 0x67f   : > { %v1981_v61 = vpop.eup %1980  ;;  %v1854_v62 = vmul.f32 -1.442695, %v1053_v58  ;;  %688 = vrot.lane.b32.xlu0 %v2254_v57, %s2029_s17  ;;  %s305_s17 = scalar_lea.vmem %s2701_s8, %s1873_s29 }
 0x680   : > { %v1068_v63 = vadd.f32 1.0, %v1981_v61  ;;  %v2499_v0 = vpop.eup %1982 }
 0x681   : > { %1986 = vpow2.f32 %v1854_v62  ;;  %v2501_v1 = vpop.eup %1984  ;;  %v1086_v5 = vmul.f32 %v2499_v0, %v2482_v50  ;;  %vm1091_vm9 = vweird.f32 %v2499_v0 }
 0x682   : > { %1988 = vrcp.f32 %v1068_v63  ;;  %v1071_v7 = vmul.f32 %v2501_v1, %v2484_v52  ;;  %v1109_v27 = vand.u32 2147483647, %v1068_v63  ;;  %v1111_v28 = vand.u32 2147483648, %v1068_v63  ;;  %vm2538_vm14 = vmor %vm1090_vm11, %vm1091_vm9 }
 0x683   : > { %v1087_v17 = vsub.f32 1.0, %v1086_v5  ;;  %vm1105_vm7 = vweird.f32 %v1068_v63  ;;  %vm1076_vm12 = vweird.f32 %v2501_v1 }
 0x684   : > { %v1072_v22 = vsub.f32 1.0, %v1071_v7  ;;  %vm1110_vm13 = vcmp.eq.f32.partialorder %v1109_v27, 8.507059e+37  ;;  %v1112_v39 = vor.u32 1.1754944e-38, %v1111_v28  ;;  %vm2554_vm0 = vmor %vm1075_vm5, %vm1076_vm12  ;;  %vm1080_vm5 = vcmp.eq.f32.partialorder %v1079_v34, 8.507059e+37 }
 0x685   : > { %v1088_v25 = vmul.f32 %v2499_v0, %v1087_v17 }
 0x686   : > { %v1073_v3 = vmul.f32 %v2501_v1, %v1072_v22 }
 0x687   : > { %v1987_v6 = vpop.eup %1986  ;;  %1312 = vrot.lane.b32.xlu0 %v2466_v24, %s2032_s22  ;;  %v1089_v30 = vadd.f32 %v2499_v0, %v1088_v25 }
 0x688   : > { %v1989_v8 = vpop.eup %1988  ;;  %v1069_v13 = vadd.f32 1.0, %v1987_v6  ;;  %v1074_v36 = vadd.f32 %v2501_v1, %v1073_v3 }
 0x689   : > { %v1101_v16 = vmul.f32 %v1989_v8, %v1068_v63  ;;  %vm1106_vm4 = vweird.f32 %v1989_v8  ;;  %v1093_v45 = vsel %vm2538_vm14, %v2499_v0, %v1089_v30  ;;  %v1082_v63 = vor.u32 1.1754944e-38, %v1081_v42 }
 0x68a   : > { %1990 = vrcp.f32 %v1069_v13  ;;  %v693_v18 = vpop.permute.xlu1 %692  ;;  %vm2526_vm10 = vmor %vm1105_vm7, %vm1106_vm4  ;;  %v1126_v37 = vand.u32 2147483648, %v1069_v13  ;;  %v1124_v44 = vand.u32 2147483647, %v1069_v13  ;;  %vm1120_vm1 = vweird.f32 %v1069_v13 }
 0x68b   : > { %v736_v19 = vadd.f32 %v2449_v4, %v693_v18  ;;  %v1102_v21 = vsub.f32 1.0, %v1101_v16  ;;  %v1078_v58 = vsel %vm2554_vm0, %v2501_v1, %v1074_v36  ;;  %v1098_v62 = vsel %vm1095_vm2, %v1097_v51, %v1093_v45 }
 0x68c   : > { %v1127_v61 = vor.u32 1.1754944e-38, %v1126_v37  ;;  %vm1125_vm4 = vcmp.eq.f32.partialorder %v1124_v44, 8.507059e+37  ;;  %v1083_v6 = vsel %vm1080_vm5, %v1082_v63, %v1078_v58  ;;  %1992 = vrcp.f32 %v2034_v41 }
 0x68d   : > { %1376 = vmatpush.msrb.mxu1 %v736_v19  ;;  %v1103_v23 = vmul.f32 %v1989_v8, %v1102_v21  ;;  %v1134_v15 = vsub.f32 1.0, %v1083_v6 }
 0x68f   : > { %1398 = vrot.lane.b32.xlu0 %v2489_v55, %s2033_s11  ;;  %1377 = vmatpush.msrb.mxu1 %v733_v20  ;;  %v1104_v26 = vadd.f32 %v1989_v8, %v1103_v23  ;;  %v1131_v20 = vmul.f32 %v1098_v62, %v2225_v48  ;;  %v1138_v21 = vmul.f32 %v1134_v15, %v2428_v40 }
 0x690   : > { %v1991_v4 = vpop.eup %1990 }
 0x691   : > { %v1116_v29 = vmul.f32 %v1991_v4, %v1069_v13  ;;  %v1108_v12 = vsel %vm2526_vm10, %v1989_v8, %v1104_v26  ;;  %vm1121_vm15 = vweird.f32 %v1991_v4  ;;  %v1135_v8 = vsub.f32 1.0, %v1098_v62 }
 0x692   : > { %v1113_v50 = vsel %vm1110_vm13, %v1112_v39, %v1108_v12  ;;  %vm1122_vm3 = vmor %vm1120_vm1, %vm1121_vm15  ;;  %v1393_v22 = vpop.permute.xlu1 %1392  ;;  %v1993_v58 = vpop.eup %1992 }
 0x693   : > { %v1117_v35 = vsub.f32 1.0, %v1116_v29  ;;  %v1136_v52 = vsub.f32 1.0, %v1113_v50  ;;  %v1132_v17 = vmul.f32 %v1113_v50, %v2222_v47  ;;  %v1139_v18 = vmul.f32 %v1135_v8, %v2423_v11  ;;  %v1311_v47 = vpop.permute.xlu2 %1310 }
 0x695   : > { %v1118_v43 = vmul.f32 %v1991_v4, %v1117_v35 }
 0x697   : > { %v1119_v54 = vadd.f32 %v1991_v4, %v1118_v43  ;;  %1459 = vrot.lane.b32.xlu0 %v2249_v56, %s2031_s19  ;;  %v1140_v56 = vmul.f32 %v1136_v52, %v2418_v10 }
 0x699   : > { %v1123_v0 = vsel %vm1122_vm3, %v1991_v4, %v1119_v54  ;;  %v1144_v19 = vadd.f32 %v1140_v56, %v1132_v17 }
 0x69a   : > { %v1128_v5 = vsel %vm1125_vm4, %v1127_v61, %v1123_v0 }
 0x69b   : > { %v1137_v7 = vsub.f32 1.0, %v1128_v5  ;;  %v1133_v1 = vmul.f32 %v1128_v5, %v2220_v46  ;;  %v1143_v46 = vadd.f32 %v1139_v18, %v1131_v20  ;;  %v1397_v3 = vpop.permute.xlu2 %1396 }
 0x69d   : > { %v1141_v13 = vmul.f32 %v1137_v7, %v2415_v33  ;;  %v1130_v33 = vmul.f32 %v1083_v6, %v2228_v49  ;;  %v1487_v6 = vmul.f32 32.0, %v1993_v58 }
 0x69f   : > { %v1145_v16 = vadd.f32 %v1141_v13, %v1133_v1  ;;  %1531 = vrot.lane.b32.xlu0 %v2254_v57, %s2030_s18  ;;  %v1142_v10 = vadd.f32 %v1138_v21, %v1130_v33  ;;  %v1488_v13 = vsub.f32 1.0, %v1487_v6 }
 0x6a1   : > { %1338 = vmatpush.msra.mxu0 %v1145_v16  ;;  %v1489_v17 = vmul.f32 %v1993_v58, %v1488_v13 }
 0x6a3   : > { %1339 = vmatpush.msra.mxu0 %v1144_v19  ;;  %v1490_v20 = vadd.f32 %v1993_v58, %v1489_v17 }
 0x6a5   : > { %1340 = vmatpush.msra.mxu0 %v1143_v46 }
 0x6a7   : > { %1341 = vmatpush.msra.mxu0 %v1142_v10  ;;  %1537 = vrot.lane.b32.xlu0 %v2261_v59, %s2030_s18  ;;  %v1395_v59 = vpop.permute.xlu1 %1394 }
 0x6a8   : > { %1859 = vmatmul.msk.f32.vlgmr.msra.gmra.mxu0 %vm408_vm8, %v1311_v47 }
 0x6af   : > { %1551 = vrot.lane.b32.xlu0 %v2266_v60, %s2028_s16  ;;  %v1315_v4 = vpop.permute.xlu1 %1314 }
 0x6b7   : > { %v1458_v36 = vpop.permute.xlu1 %1457 }
 0x6bf   : > { %v1464_v63 = vpop.permute.xlu1 %1463 }
 0x6c7   : > { %v1536_v41 = vpop.permute.xlu1 %1535 }
 0x6d9   : > { %v1956_v57 = vpop.permute.xlu0 %1955 }
 0x6da   : > { %v1957_v23 = vunpack.i.l.bf16 %v1956_v57  ;;  %v1958_v49 = vunpack.i.h.bf16 %v1956_v57 }
 0x6e9   : > { %v1961_v48 = vpop.permute.xlu0 %1960 }
 0x6ea   : > { %v1962_v11 = vunpack.i.l.bf16 %v1961_v48  ;;  %v1963_v40 = vunpack.i.h.bf16 %v1961_v48 }
 0x6ec   : > { %1436 = vmatpush.msrb.mxu3 %v1962_v11 }
 0x6ee   : > { %1437 = vmatpush.msrb.mxu3 %v1963_v40 }
 0x6f0   : > { %1438 = vmatpush.msrb.mxu3 %v1957_v23 }
 0x6f1   : > { %v689_v25 = vpop.permute.xlu0 %688 }
 0x6f2   : > { %v730_v26 = vadd.f32 %v2445_v2, %v689_v25  ;;  %1439 = vmatpush.msrb.mxu3 %v1958_v49  ;;  %v1317_v2 = vpop.permute.xlu2 %1316 }
 0x6f3   : > { %1867 = vmatmul.msk.f32.vlgmr.msrb.gmra.mxu3 %vm408_vm8, %v1393_v22 }
 0x6f4   : > { %1378 = vmatpush.msrb.mxu1 %v730_v26 }
 0x6f5   : > { %1863 = vmatmul.msk.f32.vlgmr.msrb.gmra.mxu1 %vm408_vm8, %v2454_v14 }
 0x6f9   : > { %v1313_v60 = vpop.permute.xlu0 %1312 }
 0x6fa   : > { %1860 = vmatmul.msk.f32.gmra.mxu0 %vm408_vm8, %v1313_v60  ;;  %v1462_v44 = vpop.permute.xlu2 %1461 }
 0x6fb   : > { %1868 = vmatmul.msk.f32.gmra.mxu3 %vm408_vm8, %v1395_v59 }
 0x6fd   : > { %1864 = vmatmul.msk.f32.gmra.mxu1 %vm408_vm8, %v2466_v24 }
 0x701   : > { %v1399_v14 = vpop.permute.xlu0 %1398 }
 0x702   : > { %1861 = vmatmul.msk.f32.gmra.mxu0 %vm408_vm8, %v1315_v4 }
 0x703   : > { %1869 = vmatmul.msk.f32.gmra.mxu3 %vm408_vm8, %v1397_v3 }
 0x705   : > { %1865 = vmatmul.msk.f32.gmra.mxu1 %vm408_vm8, %v2475_v38 }
 0x709   : > { %v1460_v39 = vpop.permute.xlu0 %1459 }
 0x70a   : > { %1862 = vmatmul.msk.f32.gmra.mxu0 %vm408_vm8, %v1317_v2 }
 0x70b   : > { %1870 = vmatmul.msk.f32.gmra.mxu3 %vm408_vm8, %v1399_v14 }
 0x70d   : > { %1866 = vmatmul.msk.f32.gmra.mxu1 %vm408_vm8, %v2489_v55  ;;  %vm1491_vm8 = vweird.f32 %v1993_v58 }
 0x70e   : > { %v1492_v33 = vsel %vm1491_vm8, %v1993_v58, %v1490_v20 }
 0x725   : > { %v1343_v27 = vpop.f32.mrf.mxu0 }
 0x772   : > { %v1380_v24 = vpop.f32.mrf.mxu1 }
 0x773   : > { %v1381_v12 = vadd.f32 %v1380_v24, %v1343_v27 }
 0x776   : > { %v1441_v28 = vpop.f32.mrf.mxu3 }
 0x777   : > { %v1346_v29 = vpop.f32.mrf.mxu0  ;;  %v1453_v42 = vadd.f32 %v1441_v28, %v1381_v12  ;;  %v1532_v12 = vpop.permute.xlu0 %1531 }
 0x779   : > { %v1469_v51 = vadd.f32 %v1458_v36, %v1453_v42 }
 0x77a   : > { %v1383_v30 = vpop.f32.mrf.mxu1 }
 0x77b   : > { %v1384_v34 = vadd.f32 %v1383_v30, %v1346_v29  ;;  %v1473_v0 = vsel %vm436_vm6, %v1469_v51, 0.0 }
 0x77e   : > { %v1444_v31 = vpop.f32.mrf.mxu3 }
 0x77f   : > { %v1349_v32 = vpop.f32.mrf.mxu0  ;;  %v1454_v9 = vadd.f32 %v1444_v31, %v1384_v34  ;;  %v1534_v34 = vpop.permute.xlu2 %1533 }
 0x781   : > { %v1470_v45 = vadd.f32 %v1460_v39, %v1454_v9  ;;  %v1538_v39 = vpop.permute.xlu0 %1537 }
 0x782   : > { %v1386_v35 = vpop.f32.mrf.mxu1 }
 0x783   : > { %v1387_v38 = vadd.f32 %v1386_v35, %v1349_v32  ;;  %v1474_v61 = vsel %vm436_vm6, %v1470_v45, 0.0 }
 0x784   : > { %v1475_v7 = vadd.f32 %v1474_v61, %v1473_v0  ;;  %v1550_v61 = vpop.permute.xlu1 %1549 }
 0x786   : > { %v1447_v37 = vpop.f32.mrf.mxu3 }
 0x787   : > { %v1455_v43 = vadd.f32 %v1447_v37, %v1387_v38  ;;  %v1352_v55 = vpop.f32.mrf.mxu0  ;;  %v1548_v36 = vpop.permute.xlu2 %1547 }
 0x789   : > { %v1471_v54 = vadd.f32 %v1462_v44, %v1455_v43  ;;  %v1552_v58 = vpop.permute.xlu0 %1551 }
 0x78a   : > { %v1389_v50 = vpop.f32.mrf.mxu1 }
 0x78b   : > { %v1390_v53 = vadd.f32 %v1389_v50, %v1352_v55  ;;  %v1476_v52 = vsel %vm436_vm6, %v1471_v54, 0.0 }
 0x78c   : > { %v1477_v1 = vadd.f32 %v1476_v52, %v1475_v7 }
 0x78e   : > { %v1450_v62 = vpop.f32.mrf.mxu3 }
 0x78f   : > { %v1456_v5 = vadd.f32 %v1450_v62, %v1390_v53 }
 0x791   : > { %v1472_v8 = vadd.f32 %v1464_v63, %v1456_v5 }
 0x793   : > { %v1478_v56 = vsel %vm436_vm6, %v1472_v8, 0.0 }
 0x794   : > { %v1479_v15 = vadd.f32 %v1478_v56, %v1477_v1 }
 0x796   : > { %v1480_v16 = vrot.slane %v1479_v15, 4 }
 0x798   : > { %v1481_v18 = vadd.f32 %v1480_v16, %v1479_v15 }
 0x79a   : > { %v1482_v19 = vrot.slane %v1481_v18, 2 }
 0x79c   : > { %v1483_v21 = vadd.f32 %v1482_v19, %v1481_v18 }
 0x79e   : > { %v1484_v46 = vrot.slane %v1483_v21, 1 }
 0x7a0   : > { %v1485_v10 = vadd.f32 %v1484_v46, %v1483_v21 }
 0x7a2   : > { %v1493_v47 = vmul.f32 %v1492_v33, %v1485_v10 }
 0x7a4   : > { %v1494_v57 = vsub.f32 %v1469_v51, %v1493_v47  ;;  %v1497_v48 = vsub.f32 %v1472_v8, %v1493_v47  ;;  %v1495_v11 = vsub.f32 %v1470_v45, %v1493_v47  ;;  %v1496_v40 = vsub.f32 %v1471_v54, %v1493_v47  ;;  %v1554_v54 = vpop.permute.xlu2 %1553 }
 0x7a6   : > { %v1498_v22 = vmul.f32 %v1494_v57, %v1494_v57  ;;  %v1499_v23 = vmul.f32 %v1495_v11, %v1495_v11  ;;  %v1500_v49 = vmul.f32 %v1496_v40, %v1496_v40  ;;  %v1501_v25 = vmul.f32 %v1497_v48, %v1497_v48 }
 0x7a8   : > { %v1502_v26 = vsel %vm436_vm6, %v1498_v22, 0.0  ;;  %v1503_v59 = vsel %vm436_vm6, %v1499_v23, 0.0  ;;  %v1505_v3 = vsel %vm436_vm6, %v1500_v49, 0.0  ;;  %v1507_v2 = vsel %vm436_vm6, %v1501_v25, 0.0 }
 0x7a9   : > { %v1504_v60 = vadd.f32 %v1503_v59, %v1502_v26 }
 0x7ab   : > { %v1506_v4 = vadd.f32 %v1505_v3, %v1504_v60 }
 0x7ad   : > { %v1508_v14 = vadd.f32 %v1507_v2, %v1506_v4 }
 0x7af   : > { %v1509_v27 = vrot.slane %v1508_v14, 4 }
 0x7b1   : > { %v1510_v24 = vadd.f32 %v1509_v27, %v1508_v14 }
 0x7b3   : > { %v1511_v28 = vrot.slane %v1510_v24, 2 }
 0x7b5   : > { %v1512_v29 = vadd.f32 %v1511_v28, %v1510_v24 }
 0x7b7   : > { %v1513_v30 = vrot.slane %v1512_v29, 1 }
 0x7b9   : > { %v1514_v31 = vadd.f32 %v1513_v30, %v1512_v29 }
 0x7bb   : > { %v1515_v32 = vmul.f32 %v1514_v31, %v1492_v33 }
 0x7bd   : > { %v1516_v35 = vadd.f32 1e-05, %v1515_v32 }
 0x7bf   : > { %1994 = vrsqrt.f32 %v1516_v35  ;;  %vm1523_vm9 = vweird.f32 %v1516_v35 }
 0x7c5   : > { %v1995_v38 = vpop.eup %1994 }
 0x7c6   : > { %v1518_v9 = vmul.f32 %v1995_v38, %v1516_v35  ;;  %vm1524_vm7 = vweird.f32 %v1995_v38 }
 0x7c7   : > { %vm1525_vm10 = vmor %vm1523_vm9, %vm1524_vm7 }
 0x7c8   : > { %v1519_v37 = vmul.f32 %v1995_v38, %v1518_v9 }
 0x7ca   : > { %v1520_v42 = vmul.f32 0.5, %v1519_v37 }
 0x7cc   : > { %v1521_v43 = vsub.f32 1.5, %v1520_v42 }
 0x7ce   : > { %v1522_v55 = vmul.f32 %v1995_v38, %v1521_v43 }
 0x7d0   : > { %v1526_v44 = vsel %vm1525_vm10, %v1995_v38, %v1522_v55 }
 0x7d1   : > { %v1528_v45 = vmul.f32 %v1526_v44, %v1495_v11  ;;  %v1527_v50 = vmul.f32 %v1526_v44, %v1494_v57  ;;  %v1530_v51 = vmul.f32 %v1526_v44, %v1497_v48  ;;  %v1529_v53 = vmul.f32 %v1526_v44, %v1496_v40 }
 0x7d3   : > { %v1544_v62 = vmul.f32 %v1534_v34, %v1528_v45  ;;  %v1543_v63 = vmul.f32 %v1532_v12, %v1527_v50  ;;  %v1546_v0 = vmul.f32 %v1538_v39, %v1530_v51  ;;  %v1545_v52 = vmul.f32 %v1536_v41, %v1529_v53 }
 0x7d5   : > { %v2604_v5 = vadd.f32 %v1548_v36, %v1543_v63  ;;  %v2606_v6 = vadd.f32 %v1554_v54, %v1546_v0  ;;  %v2608_v7 = vadd.f32 %v1552_v58, %v1545_v52  ;;  %v2610_v8 = vadd.f32 %v1550_v61, %v1544_v62 }
 0x7d7   : > { %v2613_v1 = vmul.f32 0.70710677, %v2604_v5  ;;  %v2616_v13 = vmul.f32 0.70710677, %v2606_v6  ;;  %v2619_v56 = vmul.f32 0.70710677, %v2608_v7 }
 0x7d8   : > { %v2622_v15 = vmul.f32 0.70710677, %v2610_v8 }
 0x7d9   : > { %v2625_v16 = vand.u32 2147483647, %v2613_v1  ;;  %v2628_v17 = vand.u32 2147483647, %v2616_v13  ;;  %v2631_v18 = vand.u32 2147483647, %v2619_v56 }
 0x7da   : > { %v2634_v19 = vand.u32 2147483647, %v2622_v15 }
 0x7db   : > { %v1575_v20 = vmul.f32 0.3275911, %v2625_v16  ;;  %v1578_v21 = vmul.f32 0.3275911, %v2628_v17  ;;  %v1577_v46 = vmul.f32 0.3275911, %v2631_v18 }
 0x7dc   : > { %v1576_v47 = vmul.f32 0.3275911, %v2634_v19  ;;  %v1679_v59 = vsub.f32 0.0, %v2625_v16  ;;  %v1682_v4 = vsub.f32 0.0, %v2628_v17  ;;  %v1681_v2 = vsub.f32 0.0, %v2631_v18 }
 0x7dd   : > { %v1579_v33 = vadd.f32 1.0, %v1575_v20  ;;  %v1582_v10 = vadd.f32 1.0, %v1578_v21  ;;  %v1581_v57 = vadd.f32 1.0, %v1577_v46 }
 0x7de   : > { %v2640_v48 = vadd.f32 1.0, %v1576_v47  ;;  %v1683_v63 = vmul.f32 %v1679_v59, %v2625_v16 }
 0x7df   : > { %1996 = vrcp.f32 %v1579_v33  ;;  %v1592_v23 = vand.u32 2147483647, %v1579_v33  ;;  %v1594_v26 = vand.u32 2147483648, %v1579_v33  ;;  %v1637_v60 = vand.u32 2147483647, %v1582_v10 }
 0x7e0   : > { %1998 = vrcp.f32 %v1582_v10  ;;  %vm1588_vm11 = vweird.f32 %v1579_v33  ;;  %vm1633_vm13 = vweird.f32 %v1582_v10  ;;  %v1639_v24 = vand.u32 2147483648, %v1582_v10 }
 0x7e1   : > { %2000 = vrcp.f32 %v1581_v57  ;;  %vm2646_vm14 = vcmp.eq.f32.partialorder %v1592_v23, 8.507059e+37  ;;  %v1595_v34 = vor.u32 1.1754944e-38, %v1594_v26  ;;  %vm2650_vm0 = vcmp.eq.f32.partialorder %v1637_v60, 8.507059e+37 }
 0x7e2   : > { %2002 = vrcp.f32 %v2640_v48  ;;  %vm1618_vm1 = vweird.f32 %v1581_v57  ;;  %v1622_v9 = vand.u32 2147483647, %v1581_v57  ;;  %v1640_v39 = vor.u32 1.1754944e-38, %v1639_v24 }
 0x7e3   : > { %v1624_v41 = vand.u32 2147483648, %v1581_v57  ;;  %v1607_v51 = vand.u32 2147483647, %v2640_v48  ;;  %v1609_v53 = vand.u32 2147483648, %v2640_v48  ;;  %vm1603_vm9 = vweird.f32 %v2640_v48 }
 0x7e4   : > { %vm1623_vm7 = vcmp.eq.f32.partialorder %v1622_v9, 8.507059e+37 }
 0x7e5   : > { %v1997_v11 = vpop.eup %1996  ;;  %v1625_v0 = vor.u32 1.1754944e-38, %v1624_v41  ;;  %v1610_v47 = vor.u32 1.1754944e-38, %v1609_v53 }
 0x7e6   : > { %v1999_v40 = vpop.eup %1998  ;;  %v1584_v22 = vmul.f32 %v1997_v11, %v1579_v33  ;;  %vm1589_vm12 = vweird.f32 %v1997_v11  ;;  %v1686_v33 = vmul.f32 %v1682_v4, %v2628_v17  ;;  %v1685_v17 = vmul.f32 %v1681_v2, %v2631_v18 }
 0x7e7   : > { %v1629_v49 = vmul.f32 %v1999_v40, %v1582_v10  ;;  %v2001_v14 = vpop.eup %2000  ;;  %vm1634_vm15 = vweird.f32 %v1999_v40  ;;  %vm1590_vm2 = vmor %vm1588_vm11, %vm1589_vm12  ;;  %vm1608_vm11 = vcmp.eq.f32.partialorder %v1607_v51, 8.507059e+37  ;;  %vm1703_vm12 = vcmp.lt.f32.partialorder %v2613_v1, 0.0 }
 0x7e8   : > { %v1585_v25 = vsub.f32 1.0, %v1584_v22  ;;  %v1614_v30 = vmul.f32 %v2001_v14, %v1581_v57  ;;  %v2003_v31 = vpop.eup %2002  ;;  %vm1635_vm3 = vmor %vm1633_vm13, %vm1634_vm15  ;;  %vm1619_vm4 = vweird.f32 %v2001_v14  ;;  %v1687_v57 = vmul.f32 1.442695, %v1683_v63 }
 0x7e9   : > { %v1630_v3 = vsub.f32 1.0, %v1629_v49  ;;  %v1599_v36 = vmul.f32 %v2003_v31, %v2640_v48  ;;  %vm1604_vm5 = vweird.f32 %v2003_v31  ;;  %vm1620_vm8 = vmor %vm1618_vm1, %vm1619_vm4  ;;  %v1680_v49 = vsub.f32 0.0, %v2634_v19 }
 0x7ea   : > { %v1586_v27 = vmul.f32 %v1997_v11, %v1585_v25  ;;  %v1615_v38 = vsub.f32 1.0, %v1614_v30  ;;  %vm1605_vm10 = vmor %vm1603_vm9, %vm1604_vm5  ;;  %v1693_v48 = vmul.f32 1.442695, %v1686_v33  ;;  %2004 = vpow2.f32 %v1687_v57 }
 0x7eb   : > { %v1631_v29 = vmul.f32 %v1999_v40, %v1630_v3  ;;  %v1600_v44 = vsub.f32 1.0, %v1599_v36  ;;  %v1684_v24 = vmul.f32 %v1680_v49, %v2634_v19  ;;  %vm1706_vm13 = vcmp.lt.f32.partialorder %v2616_v13, 0.0 }
 0x7ec   : > { %v1587_v32 = vadd.f32 %v1997_v11, %v1586_v27  ;;  %v1616_v55 = vmul.f32 %v2001_v14, %v1615_v38  ;;  %2006 = vpow2.f32 %v1693_v48  ;;  %v1566_v1 = vmul.f32 0.5, %v2606_v6 }
 0x7ed   : > { %v1632_v12 = vadd.f32 %v1999_v40, %v1631_v29  ;;  %v1601_v61 = vmul.f32 %v2003_v31, %v1600_v44  ;;  %v1689_v9 = vmul.f32 1.442695, %v1684_v24  ;;  %v1565_v49 = vmul.f32 0.5, %v2608_v7 }
 0x7ee   : > { %v1591_v37 = vsel %vm1590_vm2, %v1997_v11, %v1587_v32  ;;  %v1617_v58 = vadd.f32 %v2001_v14, %v1616_v55  ;;  %v1691_v32 = vmul.f32 1.442695, %v1685_v17  ;;  %vm1704_vm15 = vcmp.lt.f32.partialorder %v2622_v15, 0.0 }
 0x7ef   : > { %v1596_v42 = vsel %vm2646_vm14, %v1595_v34, %v1591_v37  ;;  %v1636_v43 = vsel %vm1635_vm3, %v1999_v40, %v1632_v12  ;;  %v1602_v21 = vadd.f32 %v2003_v31, %v1601_v61  ;;  %vm1705_vm14 = vcmp.lt.f32.partialorder %v2619_v56, 0.0 }
 0x7f0   : > { %v1643_v45 = vmul.f32 1.0614054, %v1596_v42  ;;  %v1641_v50 = vsel %vm2650_vm0, %v1640_v39, %v1636_v43  ;;  %v1621_v20 = vsel %vm1620_vm8, %v2001_v14, %v1617_v58  ;;  %2008 = vpow2.f32 %v1691_v32  ;;  %v2005_v39 = vpop.eup %2004 }
 0x7f1   : > { %v1646_v54 = vmul.f32 1.0614054, %v1641_v50  ;;  %v1626_v10 = vsel %vm1623_vm7, %v1625_v0, %v1621_v20  ;;  %v1606_v22 = vsel %vm1605_vm10, %v2003_v31, %v1602_v21  ;;  %2010 = vpow2.f32 %v1689_v9 }
 0x7f2   : > { %v1647_v62 = vadd.f32 -1.4531521, %v1643_v45  ;;  %v1645_v40 = vmul.f32 1.0614054, %v1626_v10  ;;  %v1611_v23 = vsel %vm1608_vm11, %v1610_v47, %v1606_v22  ;;  %v2007_v55 = vpop.eup %2006  ;;  %v1563_v21 = vmul.f32 0.5, %v2604_v5 }
 0x7f3   : > { %v1650_v52 = vadd.f32 -1.4531521, %v1646_v54  ;;  %v1644_v59 = vmul.f32 1.0614054, %v1611_v23 }
 0x7f4   : > { %v1651_v46 = vmul.f32 %v1647_v62, %v1596_v42  ;;  %v1649_v26 = vadd.f32 -1.4531521, %v1645_v40 }
 0x7f5   : > { %v1654_v11 = vmul.f32 %v1650_v52, %v1641_v50  ;;  %v1648_v14 = vadd.f32 -1.4531521, %v1644_v59  ;;  %v1564_v59 = vmul.f32 0.5, %v2610_v8 }
 0x7f6   : > { %v1655_v16 = vadd.f32 1.4214138, %v1651_v46  ;;  %v1653_v4 = vmul.f32 %v1649_v26, %v1626_v10  ;;  %v2009_v63 = vpop.eup %2008 }
 0x7f7   : > { %v1658_v25 = vadd.f32 1.4214138, %v1654_v11  ;;  %v1652_v30 = vmul.f32 %v1648_v14, %v1611_v23  ;;  %v2011_v20 = vpop.eup %2010 }
 0x7f8   : > { %v1659_v60 = vmul.f32 %v1655_v16, %v1596_v42  ;;  %v1657_v29 = vadd.f32 1.4214138, %v1653_v4 }
 0x7f9   : > { %v1662_v3 = vmul.f32 %v1658_v25, %v1641_v50  ;;  %v1656_v12 = vadd.f32 1.4214138, %v1652_v30 }
 0x7fa   : > { %v1663_v27 = vadd.f32 -0.28449672, %v1659_v60  ;;  %v1661_v35 = vmul.f32 %v1657_v29, %v1626_v10 }
 0x7fb   : > { %v1666_v28 = vadd.f32 -0.28449672, %v1662_v3  ;;  %v1660_v2 = vmul.f32 %v1656_v12, %v1611_v23 }
 0x7fc   : > { %v1667_v31 = vmul.f32 %v1663_v27, %v1596_v42  ;;  %v1665_v18 = vadd.f32 -0.28449672, %v1661_v35 }
 0x7fd   : > { %v1670_v34 = vmul.f32 %v1666_v28, %v1641_v50  ;;  %v1664_v43 = vadd.f32 -0.28449672, %v1660_v2 }
 0x7fe   : > { %v1671_v38 = vadd.f32 0.2548296, %v1667_v31  ;;  %v1669_v19 = vmul.f32 %v1665_v18, %v1626_v10 }
 0x7ff   : > { %v1674_v36 = vadd.f32 0.2548296, %v1670_v34  ;;  %v1668_v53 = vmul.f32 %v1664_v43, %v1611_v23 }
 0x800   : > { %v1675_v37 = vmul.f32 %v1671_v38, %v1596_v42  ;;  %v1673_v51 = vadd.f32 0.2548296, %v1669_v19 }
 0x801   : > { %v1678_v41 = vmul.f32 %v1674_v36, %v1641_v50  ;;  %v1672_v62 = vadd.f32 0.2548296, %v1668_v53 }
 0x802   : > { %v1695_v44 = vmul.f32 %v2005_v39, %v1675_v37  ;;  %v1677_v61 = vmul.f32 %v1673_v51, %v1626_v10 }
 0x803   : > { %v1698_v45 = vmul.f32 %v2007_v55, %v1678_v41  ;;  %v1676_v50 = vmul.f32 %v1672_v62, %v1611_v23 }
 0x804   : > { %v1699_v54 = vsub.f32 1.0, %v1695_v44  ;;  %v1697_v52 = vmul.f32 %v2009_v63, %v1677_v61 }
 0x805   : > { %v1702_v58 = vsub.f32 1.0, %v1698_v45  ;;  %v1696_v40 = vmul.f32 %v2011_v20, %v1676_v50 }
 0x806   : > { %v1707_v0 = vsub.f32 0.0, %v1699_v54  ;;  %v1701_v11 = vsub.f32 1.0, %v1697_v52 }
 0x807   : > { %v1710_v42 = vsub.f32 0.0, %v1702_v58  ;;  %v1700_v57 = vsub.f32 1.0, %v1696_v40 }
 0x808   : > { %v1711_v46 = vsel %vm1703_vm12, %v1707_v0, %v1699_v54  ;;  %v1709_v16 = vsub.f32 0.0, %v1701_v11 }
 0x809   : > { %v1715_v33 = vadd.f32 1.0, %v1711_v46  ;;  %v1714_v47 = vsel %vm1706_vm13, %v1710_v42, %v1702_v58  ;;  %v1708_v13 = vsub.f32 0.0, %v1700_v57 }
 0x80a   : > { %v1718_v10 = vadd.f32 1.0, %v1714_v47  ;;  %v1713_v5 = vsel %vm1705_vm14, %v1709_v16, %v1701_v11 }
 0x80b   : > { %v1719_v22 = vmul.f32 %v1715_v33, %v1563_v21  ;;  %v1717_v25 = vadd.f32 1.0, %v1713_v5  ;;  %v1712_v26 = vsel %vm1704_vm15, %v1708_v13, %v1700_v57 }
 0x80c   : > { %v1722_v23 = vmul.f32 %v1718_v10, %v1566_v1  ;;  %v1716_v60 = vadd.f32 1.0, %v1712_v26 }
 0x80d   : > { %1723 = vst.msk [vmem:[%s305_s17] sm:$0xff] %vm436_vm6, %v1719_v22  ;;  %v1721_v6 = vmul.f32 %v1717_v25, %v1565_v49 }
 0x80e   : > { %1726 = vst.msk [vmem:[%s305_s17 + $0x18] sm:$0xff] %vm436_vm6, %v1722_v23  ;;  %v1720_v48 = vmul.f32 %v1716_v60, %v1564_v59 }
 0x80f   : > { %1725 = vst.msk [vmem:[%s305_s17 + $0x10] sm:$0xff] %vm436_vm6, %v1721_v6 }
 0x810   : > { %1724 = vst.msk [vmem:[%s305_s17 + $0x8] sm:$0xff] %vm436_vm6, %v1720_v48 }
 0x811 PF: > { %s18_s27 = sadd.s32 1, %s2018_s27  }
 0x812   : > { %p15_p4 = scmp.ge.s32.totalorder %s18_s27, 4  }
 0x814   :  { %17 = sbr.rel (!%p15_p4) target bundleno = 1 (0x1), region = 82 }

</bundles_post_ra>
